<compile_context>
chip_gen: v7x
topology: tpu7x:2x2x1
jax: 0.10.0
libtpu: 0.0.40
codegen_flags: <defaults>
</compile_context>

<pallas_src>
import functools
import math

import jax
import jax.numpy as jnp
from jax.experimental import pallas as pl
from jax.experimental.pallas import tpu as pltpu

NUM_CLASSES = 19
LN_EPS = 1e-3  # LayerNormalization eps, added to (unbiased) std


# ---------------------------------------------------------------------------
# in-kernel helpers
# ---------------------------------------------------------------------------
def _layer_norm(z, gamma, beta, eps):
    """Matches LayerNormalization.forward: torch .std() is unbiased (N-1)."""
    n = z.shape[-1]
    mean = jnp.mean(z, axis=-1, keepdims=True)
    d = z - mean
    var = jnp.sum(d * d, axis=-1, keepdims=True) * (1.0 / (n - 1))
    std = jnp.sqrt(var)
    inv = pl.reciprocal(std + eps, approx=True)        # EUP, not VALU divide
    return gamma * (d * inv) + beta


# ---------------------------------------------------------------------------
# single fused encoder-layer + classifier kernel (one batch per grid step)
# ---------------------------------------------------------------------------
def _encoder_kernel(h_ref, wqkv_ref, wp_ref, bp_ref, g1_ref, be1_ref,
                    w1_ref, b1_ref, w2_ref, b2_ref, g2_ref, be2_ref,
                    wo_ref, bo_ref, o_ref, *, n_heads, d_k, d_v, eps, scale):
    h = h_ref[0]                                                    # (S, D)

    # --- fused QKV projection: one lane-dense MXU matmul --------------------
    qkv = jnp.dot(h, wqkv_ref[...],
                  preferred_element_type=jnp.float32)               # (S, 2*H*dk + H*dv)
    hk = n_heads * d_k
    hv = n_heads * d_v
    q_all = qkv[:, :hk]                                             # (S, H*dk)
    k_all = qkv[:, hk:2 * hk]                                       # (S, H*dk)
    v_all = qkv[:, 2 * hk:2 * hk + hv]                              # (S, H*dv)

    inv_scale = 1.0 / scale
    outs = []
    for hd in range(n_heads):                                       # static unroll (H=4)
        q = q_all[:, hd * d_k:(hd + 1) * d_k]                       # (S, dk)
        k = k_all[:, hd * d_k:(hd + 1) * d_k]                       # (S, dk)
        v = v_all[:, hd * d_v:(hd + 1) * d_v]                       # (S, dv)
        # scores = q @ k^T without materializing the transpose.
        s = jax.lax.dot_general(q, k, (((1,), (1,)), ((), ())),
                                preferred_element_type=jnp.float32) * inv_scale
        s = s - jnp.max(s, axis=-1, keepdims=True)
        p = jnp.exp(s)
        p = p * pl.reciprocal(jnp.sum(p, axis=-1, keepdims=True), approx=True)
        outs.append(jnp.dot(p, v, preferred_element_type=jnp.float32))
    # head-major concat, matches torch.split(..., b_size, dim=0) + cat(dim=-1)
    attn_cat = jnp.concatenate(outs, axis=-1)                       # (S, H*dv)

    # --- output projection + residual + LayerNorm ----------------------------
    y = jnp.dot(attn_cat, wp_ref[...],
                preferred_element_type=jnp.float32) + bp_ref[...]   # (S, D)
    a1 = _layer_norm(h + y, g1_ref[...], be1_ref[...], eps)

    # --- position-wise FFN (1x1 convs as matmuls) + residual + LayerNorm -----
    f1 = jnp.dot(a1, w1_ref[...],
                 preferred_element_type=jnp.float32) + b1_ref[...]  # (S, F)
    f1 = jnp.maximum(f1, 0.0)                                       # ReLU
    f2 = jnp.dot(f1, w2_ref[...],
                 preferred_element_type=jnp.float32) + b2_ref[...]  # (S, D)
    enc = _layer_norm(a1 + f2, g2_ref[...], be2_ref[...], eps)

    # --- classifier on the CLS token (row 0), fused in ------------------------
    cls_vec = enc[0:1, :]                                           # (1, D)
    logits = jnp.dot(cls_vec, wo_ref[...],
                     preferred_element_type=jnp.float32) + bo_ref[...]  # (1, C)
    o_ref[0] = logits.astype(o_ref.dtype)


# ---------------------------------------------------------------------------
# forward pass: host does only the CLS-token concat; everything else fused
# ---------------------------------------------------------------------------
@functools.partial(jax.jit, static_argnames=("n_heads", "d_k", "d_v"))
def transformer_forward(x, p, *, n_heads, d_k, d_v):
    B, S, D = x.shape
    S1 = S + 1
    # Embeddings: prepend the classifier token (tiny, left to XLA).
    cls = jnp.broadcast_to(p["cls_token"], (B, 1, D))
    h = jnp.concatenate([cls, x], axis=1)                           # (B, S1, D)

    QKV = p["w_qkv"].shape[-1]
    HV = p["w_proj"].shape[0]
    F = p["w1"].shape[-1]
    C = p["w_out"].shape[-1]

    kernel = functools.partial(_encoder_kernel, n_heads=n_heads, d_k=d_k,
                               d_v=d_v, eps=LN_EPS, scale=math.sqrt(d_k))

    out = pl.pallas_call(
        kernel,
        out_shape=jax.ShapeDtypeStruct((B, 1, C), x.dtype),
        grid=(B,),
        in_specs=[
            pl.BlockSpec((1, S1, D), lambda b: (b, 0, 0)),   # activations
            pl.BlockSpec((D, QKV), lambda b: (0, 0)),        # fused W_qkv
            pl.BlockSpec((HV, D), lambda b: (0, 0)),         # proj W
            pl.BlockSpec((1, D), lambda b: (0, 0)),          # proj b
            pl.BlockSpec((1, D), lambda b: (0, 0)),          # ln1 gamma
            pl.BlockSpec((1, D), lambda b: (0, 0)),          # ln1 beta
            pl.BlockSpec((D, F), lambda b: (0, 0)),          # ffn W1
            pl.BlockSpec((1, F), lambda b: (0, 0)),          # ffn b1
            pl.BlockSpec((F, D), lambda b: (0, 0)),          # ffn W2
            pl.BlockSpec((1, D), lambda b: (0, 0)),          # ffn b2
            pl.BlockSpec((1, D), lambda b: (0, 0)),          # ln2 gamma
            pl.BlockSpec((1, D), lambda b: (0, 0)),          # ln2 beta
            pl.BlockSpec((D, C), lambda b: (0, 0)),          # classifier W
            pl.BlockSpec((1, C), lambda b: (0, 0)),          # classifier b
        ],
        out_specs=pl.BlockSpec((1, 1, C), lambda b: (b, 0, 0)),
        compiler_params=pltpu.CompilerParams(
            dimension_semantics=("parallel",)),               # v7x: 2 TCs, one batch each
    )(h, p["w_qkv"], p["w_proj"], p["b_proj"], p["ln1_gamma"], p["ln1_beta"],
      p["w1"], p["b1"], p["w2"], p["b2"], p["ln2_gamma"], p["ln2_beta"],
      p["w_out"], p["b_out"])

    return out[:, 0, :]                                             # (B, C)


# ---------------------------------------------------------------------------
# parameter construction (PyTorch-shaped) + one-time kernel-layout prep
# ---------------------------------------------------------------------------
def make_params(key, d_model, d_k, d_v, d_ff, n_heads, n_classes):
    ks = jax.random.split(key, 12)

    def xavier(k, shape, fan_in, fan_out):
        std = math.sqrt(2.0 / (fan_in + fan_out))
        return std * jax.random.normal(k, shape, dtype=jnp.float32)

    hv = n_heads * d_v
    return dict(
        cls_token=jnp.zeros((1, 1, d_model), jnp.float32),
        w_q=xavier(ks[0], (n_heads, d_model, d_k), d_model, d_k),
        w_k=xavier(ks[1], (n_heads, d_model, d_k), d_model, d_k),
        w_v=xavier(ks[2], (n_heads, d_model, d_v), d_model, d_v),
        # proj Linear(n_heads*d_v -> d_model), stored as (in, out)
        w_proj=xavier(ks[3], (hv, d_model), hv, d_model),
        b_proj=0.01 * jax.random.normal(ks[4], (1, d_model), jnp.float32),
        ln1_gamma=jnp.ones((1, d_model), jnp.float32),
        ln1_beta=jnp.zeros((1, d_model), jnp.float32),
        # conv1d(k=1) d_model -> d_ff and back, stored as (in, out)
        w1=xavier(ks[5], (d_model, d_ff), d_model, d_ff),
        b1=0.01 * jax.random.normal(ks[6], (1, d_ff), jnp.float32),
        w2=xavier(ks[7], (d_ff, d_model), d_ff, d_model),
        b2=0.01 * jax.random.normal(ks[8], (1, d_model), jnp.float32),
        ln2_gamma=jnp.ones((1, d_model), jnp.float32),
        ln2_beta=jnp.zeros((1, d_model), jnp.float32),
        # final nn.Linear(d_model -> NUM_CLASSES), stored as (in, out)
        w_out=xavier(ks[9], (d_model, n_classes), d_model, n_classes),
        b_out=0.01 * jax.random.normal(ks[10], (1, n_classes), jnp.float32),
    )


def prepare_params(p, n_heads, d_k, d_v):
    """One-time re-layout: concat per-head Q/K/V weights into (D, H*(2dk+dv)).

    Column block [h*dk:(h+1)*dk] of each group equals the original per-head
    weight, so head-major ordering matches torch.split(...)+cat(dim=-1).
    """
    D = p["w_q"].shape[1]
    wq = jnp.transpose(p["w_q"], (1, 0, 2)).reshape(D, n_heads * d_k)
    wk = jnp.transpose(p["w_k"], (1, 0, 2)).reshape(D, n_heads * d_k)
    wv = jnp.transpose(p["w_v"], (1, 0, 2)).reshape(D, n_heads * d_v)
    w_qkv = jnp.concatenate([wq, wk, wv], axis=1)
    out = {k: v for k, v in p.items() if k not in ("w_q", "w_k", "w_v")}
    out["w_qkv"] = w_qkv
    return out


if __name__ == "__main__":
    # Small shapes consistent with the module structure (scaled-down MODEL_DIM).
    B, SEQ = 2, 7                    # sequence becomes SEQ+1 = 8 after CLS token
    D_MODEL, D_K, D_V, N_HEADS = 256, 64, 64, 4
    D_FF = D_MODEL                   # FF_DIM = MODEL_DIM * 1

    key = jax.random.PRNGKey(0)
    k_x, k_p = jax.random.split(key)
    x = jax.random.normal(k_x, (B, SEQ, D_MODEL), dtype=jnp.float32)
    raw_params = make_params(k_p, D_MODEL, D_K, D_V, D_FF, N_HEADS, NUM_CLASSES)
    params = prepare_params(raw_params, N_HEADS, D_K, D_V)

    # TODO(synk): nn.Dropout layers are identity here (inference semantics).
    out = transformer_forward(x, params, n_heads=N_HEADS, d_k=D_K, d_v=D_V)
    out = jax.block_until_ready(out)
    assert out.shape == (B, NUM_CLASSES), out.shape
    assert bool(jnp.all(jnp.isfinite(out)))
    print("KERNEL_OK")
</pallas_src>

<mosaic_0001>
module attributes {stable_mosaic.version = 11 : i64} {
  func.func @_encoder_kernel(%arg0: i32, %arg1: memref<1x8x256xf32, #tpu.memory_space<vmem>>, %arg2: memref<256x768xf32, #tpu.memory_space<vmem>>, %arg3: memref<256x256xf32, #tpu.memory_space<vmem>>, %arg4: memref<1x256xf32, #tpu.memory_space<vmem>>, %arg5: memref<1x256xf32, #tpu.memory_space<vmem>>, %arg6: memref<1x256xf32, #tpu.memory_space<vmem>>, %arg7: memref<256x256xf32, #tpu.memory_space<vmem>>, %arg8: memref<1x256xf32, #tpu.memory_space<vmem>>, %arg9: memref<256x256xf32, #tpu.memory_space<vmem>>, %arg10: memref<1x256xf32, #tpu.memory_space<vmem>>, %arg11: memref<1x256xf32, #tpu.memory_space<vmem>>, %arg12: memref<1x256xf32, #tpu.memory_space<vmem>>, %arg13: memref<256x19xf32, #tpu.memory_space<vmem>>, %arg14: memref<1x19xf32, #tpu.memory_space<vmem>>, %arg15: memref<1x1x19xf32, #tpu.memory_space<vmem>>) attributes {dimension_semantics = [#tpu.dimension_semantics<parallel>], iteration_bounds = array<i64: 2>, scalar_prefetch = 0 : i64, scratch_operands = 0 : i64, tpu.core_type = #tpu.core_type<tc>, window_params = [{transform_indices = @transform_0, window_bounds = array<i64: 1, 8, 256>}, {pipeline_mode = #tpu.pipeline_mode<synchronous>, transform_indices = @transform_1, window_bounds = array<i64: 256, 768>}, {pipeline_mode = #tpu.pipeline_mode<synchronous>, transform_indices = @transform_2, window_bounds = array<i64: 256, 256>}, {pipeline_mode = #tpu.pipeline_mode<synchronous>, transform_indices = @transform_3, window_bounds = array<i64: 1, 256>}, {pipeline_mode = #tpu.pipeline_mode<synchronous>, transform_indices = @transform_4, window_bounds = array<i64: 1, 256>}, {pipeline_mode = #tpu.pipeline_mode<synchronous>, transform_indices = @transform_5, window_bounds = array<i64: 1, 256>}, {pipeline_mode = #tpu.pipeline_mode<synchronous>, transform_indices = @transform_6, window_bounds = array<i64: 256, 256>}, {pipeline_mode = #tpu.pipeline_mode<synchronous>, transform_indices = @transform_7, window_bounds = array<i64: 1, 256>}, {pipeline_mode = #tpu.pipeline_mode<synchronous>, transform_indices = @transform_8, window_bounds = array<i64: 256, 256>}, {pipeline_mode = #tpu.pipeline_mode<synchronous>, transform_indices = @transform_9, window_bounds = array<i64: 1, 256>}, {pipeline_mode = #tpu.pipeline_mode<synchronous>, transform_indices = @transform_10, window_bounds = array<i64: 1, 256>}, {pipeline_mode = #tpu.pipeline_mode<synchronous>, transform_indices = @transform_11, window_bounds = array<i64: 1, 256>}, {pipeline_mode = #tpu.pipeline_mode<synchronous>, transform_indices = @transform_12, window_bounds = array<i64: 256, 19>}, {pipeline_mode = #tpu.pipeline_mode<synchronous>, transform_indices = @transform_13, window_bounds = array<i64: 1, 19>}, {transform_indices = @transform_14, window_bounds = array<i64: 1, 1, 19>}]} {
    %c0 = arith.constant 0 : index
    %c0_0 = arith.constant 0 : index
    %c0_1 = arith.constant 0 : index
    %0 = vector.load %arg1[%c0, %c0_0, %c0_1] : memref<1x8x256xf32, #tpu.memory_space<vmem>>, vector<1x8x256xf32>
    %1 = vector.shape_cast %0 : vector<1x8x256xf32> to vector<8x256xf32>
    %c0_2 = arith.constant 0 : index
    %c0_3 = arith.constant 0 : index
    %2 = vector.load %arg2[%c0_2, %c0_3] : memref<256x768xf32, #tpu.memory_space<vmem>>, vector<256x768xf32>
    %cst = arith.constant dense<0.000000e+00> : vector<8x768xf32>
    %3 = tpu.matmul %1, %2, %cst {dimension_numbers = #tpu.dot_dimension_numbers<[1], [0], [0], [1], [0, 0, 1, 1], [], []>} : vector<8x256xf32>, vector<256x768xf32>, vector<8x768xf32> -> vector<8x768xf32>
    %4 = vector.extract_strided_slice %3 {offsets = [0, 0], sizes = [8, 256], strides = [1, 1]} : vector<8x768xf32> to vector<8x256xf32>
    %5 = vector.extract_strided_slice %3 {offsets = [0, 256], sizes = [8, 256], strides = [1, 1]} : vector<8x768xf32> to vector<8x256xf32>
    %6 = vector.extract_strided_slice %3 {offsets = [0, 512], sizes = [8, 256], strides = [1, 1]} : vector<8x768xf32> to vector<8x256xf32>
    %7 = vector.extract_strided_slice %4 {offsets = [0, 0], sizes = [8, 64], strides = [1, 1]} : vector<8x256xf32> to vector<8x64xf32>
    %8 = vector.extract_strided_slice %5 {offsets = [0, 0], sizes = [8, 64], strides = [1, 1]} : vector<8x256xf32> to vector<8x64xf32>
    %9 = vector.extract_strided_slice %6 {offsets = [0, 0], sizes = [8, 64], strides = [1, 1]} : vector<8x256xf32> to vector<8x64xf32>
    %cst_4 = arith.constant dense<0.000000e+00> : vector<8x8xf32>
    %10 = tpu.matmul %7, %8, %cst_4 {dimension_numbers = #tpu.dot_dimension_numbers<[1], [1], [0], [0], [0, 0, 1, 0], [], []>} : vector<8x64xf32>, vector<8x64xf32>, vector<8x8xf32> -> vector<8x8xf32>
    %cst_5 = arith.constant 1.250000e-01 : f32
    %11 = vector.broadcast %cst_5 : f32 to vector<8x8xf32>
    %12 = arith.mulf %10, %11 : vector<8x8xf32>
    %cst_6 = arith.constant dense<0xFF800000> : vector<8xf32>
    %13 = vector.multi_reduction <maximumf>, %12, %cst_6 [1] : vector<8x8xf32> to vector<8xf32>
    %14 = vector.shape_cast %13 : vector<8xf32> to vector<8x1xf32>
    %15 = vector.broadcast %14 : vector<8x1xf32> to vector<8x8xf32>
    %16 = arith.subf %12, %15 : vector<8x8xf32>
    %17 = math.exp %16 : vector<8x8xf32>
    %cst_7 = arith.constant dense<0.000000e+00> : vector<8xf32>
    %18 = vector.multi_reduction <add>, %17, %cst_7 [1] : vector<8x8xf32> to vector<8xf32>
    %19 = vector.shape_cast %18 : vector<8xf32> to vector<8x1xf32>
    %20 = tpu.reciprocal %19 {approx = true} : vector<8x1xf32> -> vector<8x1xf32>
    %21 = vector.broadcast %20 : vector<8x1xf32> to vector<8x8xf32>
    %22 = arith.mulf %17, %21 : vector<8x8xf32>
    %cst_8 = arith.constant dense<0.000000e+00> : vector<8x64xf32>
    %23 = tpu.matmul %22, %9, %cst_8 {dimension_numbers = #tpu.dot_dimension_numbers<[1], [0], [0], [1], [0, 0, 1, 1], [], []>} : vector<8x8xf32>, vector<8x64xf32>, vector<8x64xf32> -> vector<8x64xf32>
    %24 = vector.extract_strided_slice %4 {offsets = [0, 64], sizes = [8, 64], strides = [1, 1]} : vector<8x256xf32> to vector<8x64xf32>
    %25 = vector.extract_strided_slice %5 {offsets = [0, 64], sizes = [8, 64], strides = [1, 1]} : vector<8x256xf32> to vector<8x64xf32>
    %26 = vector.extract_strided_slice %6 {offsets = [0, 64], sizes = [8, 64], strides = [1, 1]} : vector<8x256xf32> to vector<8x64xf32>
    %cst_9 = arith.constant dense<0.000000e+00> : vector<8x8xf32>
    %27 = tpu.matmul %24, %25, %cst_9 {dimension_numbers = #tpu.dot_dimension_numbers<[1], [1], [0], [0], [0, 0, 1, 0], [], []>} : vector<8x64xf32>, vector<8x64xf32>, vector<8x8xf32> -> vector<8x8xf32>
    %cst_10 = arith.constant 1.250000e-01 : f32
    %28 = vector.broadcast %cst_10 : f32 to vector<8x8xf32>
    %29 = arith.mulf %27, %28 : vector<8x8xf32>
    %cst_11 = arith.constant dense<0xFF800000> : vector<8xf32>
    %30 = vector.multi_reduction <maximumf>, %29, %cst_11 [1] : vector<8x8xf32> to vector<8xf32>
    %31 = vector.shape_cast %30 : vector<8xf32> to vector<8x1xf32>
    %32 = vector.broadcast %31 : vector<8x1xf32> to vector<8x8xf32>
    %33 = arith.subf %29, %32 : vector<8x8xf32>
    %34 = math.exp %33 : vector<8x8xf32>
    %cst_12 = arith.constant dense<0.000000e+00> : vector<8xf32>
    %35 = vector.multi_reduction <add>, %34, %cst_12 [1] : vector<8x8xf32> to vector<8xf32>
    %36 = vector.shape_cast %35 : vector<8xf32> to vector<8x1xf32>
    %37 = tpu.reciprocal %36 {approx = true} : vector<8x1xf32> -> vector<8x1xf32>
    %38 = vector.broadcast %37 : vector<8x1xf32> to vector<8x8xf32>
    %39 = arith.mulf %34, %38 : vector<8x8xf32>
    %cst_13 = arith.constant dense<0.000000e+00> : vector<8x64xf32>
    %40 = tpu.matmul %39, %26, %cst_13 {dimension_numbers = #tpu.dot_dimension_numbers<[1], [0], [0], [1], [0, 0, 1, 1], [], []>} : vector<8x8xf32>, vector<8x64xf32>, vector<8x64xf32> -> vector<8x64xf32>
    %41 = vector.extract_strided_slice %4 {offsets = [0, 128], sizes = [8, 64], strides = [1, 1]} : vector<8x256xf32> to vector<8x64xf32>
    %42 = vector.extract_strided_slice %5 {offsets = [0, 128], sizes = [8, 64], strides = [1, 1]} : vector<8x256xf32> to vector<8x64xf32>
    %43 = vector.extract_strided_slice %6 {offsets = [0, 128], sizes = [8, 64], strides = [1, 1]} : vector<8x256xf32> to vector<8x64xf32>
    %cst_14 = arith.constant dense<0.000000e+00> : vector<8x8xf32>
    %44 = tpu.matmul %41, %42, %cst_14 {dimension_numbers = #tpu.dot_dimension_numbers<[1], [1], [0], [0], [0, 0, 1, 0], [], []>} : vector<8x64xf32>, vector<8x64xf32>, vector<8x8xf32> -> vector<8x8xf32>
    %cst_15 = arith.constant 1.250000e-01 : f32
    %45 = vector.broadcast %cst_15 : f32 to vector<8x8xf32>
    %46 = arith.mulf %44, %45 : vector<8x8xf32>
    %cst_16 = arith.constant dense<0xFF800000> : vector<8xf32>
    %47 = vector.multi_reduction <maximumf>, %46, %cst_16 [1] : vector<8x8xf32> to vector<8xf32>
    %48 = vector.shape_cast %47 : vector<8xf32> to vector<8x1xf32>
    %49 = vector.broadcast %48 : vector<8x1xf32> to vector<8x8xf32>
    %50 = arith.subf %46, %49 : vector<8x8xf32>
    %51 = math.exp %50 : vector<8x8xf32>
    %cst_17 = arith.constant dense<0.000000e+00> : vector<8xf32>
    %52 = vector.multi_reduction <add>, %51, %cst_17 [1] : vector<8x8xf32> to vector<8xf32>
    %53 = vector.shape_cast %52 : vector<8xf32> to vector<8x1xf32>
    %54 = tpu.reciprocal %53 {approx = true} : vector<8x1xf32> -> vector<8x1xf32>
    %55 = vector.broadcast %54 : vector<8x1xf32> to vector<8x8xf32>
    %56 = arith.mulf %51, %55 : vector<8x8xf32>
    %cst_18 = arith.constant dense<0.000000e+00> : vector<8x64xf32>
    %57 = tpu.matmul %56, %43, %cst_18 {dimension_numbers = #tpu.dot_dimension_numbers<[1], [0], [0], [1], [0, 0, 1, 1], [], []>} : vector<8x8xf32>, vector<8x64xf32>, vector<8x64xf32> -> vector<8x64xf32>
    %58 = vector.extract_strided_slice %4 {offsets = [0, 192], sizes = [8, 64], strides = [1, 1]} : vector<8x256xf32> to vector<8x64xf32>
    %59 = vector.extract_strided_slice %5 {offsets = [0, 192], sizes = [8, 64], strides = [1, 1]} : vector<8x256xf32> to vector<8x64xf32>
    %60 = vector.extract_strided_slice %6 {offsets = [0, 192], sizes = [8, 64], strides = [1, 1]} : vector<8x256xf32> to vector<8x64xf32>
    %cst_19 = arith.constant dense<0.000000e+00> : vector<8x8xf32>
    %61 = tpu.matmul %58, %59, %cst_19 {dimension_numbers = #tpu.dot_dimension_numbers<[1], [1], [0], [0], [0, 0, 1, 0], [], []>} : vector<8x64xf32>, vector<8x64xf32>, vector<8x8xf32> -> vector<8x8xf32>
    %cst_20 = arith.constant 1.250000e-01 : f32
    %62 = vector.broadcast %cst_20 : f32 to vector<8x8xf32>
    %63 = arith.mulf %61, %62 : vector<8x8xf32>
    %cst_21 = arith.constant dense<0xFF800000> : vector<8xf32>
    %64 = vector.multi_reduction <maximumf>, %63, %cst_21 [1] : vector<8x8xf32> to vector<8xf32>
    %65 = vector.shape_cast %64 : vector<8xf32> to vector<8x1xf32>
    %66 = vector.broadcast %65 : vector<8x1xf32> to vector<8x8xf32>
    %67 = arith.subf %63, %66 : vector<8x8xf32>
    %68 = math.exp %67 : vector<8x8xf32>
    %cst_22 = arith.constant dense<0.000000e+00> : vector<8xf32>
    %69 = vector.multi_reduction <add>, %68, %cst_22 [1] : vector<8x8xf32> to vector<8xf32>
    %70 = vector.shape_cast %69 : vector<8xf32> to vector<8x1xf32>
    %71 = tpu.reciprocal %70 {approx = true} : vector<8x1xf32> -> vector<8x1xf32>
    %72 = vector.broadcast %71 : vector<8x1xf32> to vector<8x8xf32>
    %73 = arith.mulf %68, %72 : vector<8x8xf32>
    %cst_23 = arith.constant dense<0.000000e+00> : vector<8x64xf32>
    %74 = tpu.matmul %73, %60, %cst_23 {dimension_numbers = #tpu.dot_dimension_numbers<[1], [0], [0], [1], [0, 0, 1, 1], [], []>} : vector<8x8xf32>, vector<8x64xf32>, vector<8x64xf32> -> vector<8x64xf32>
    %75 = tpu.concatenate %23, %40, %57, %74 in 1 : vector<8x64xf32>, vector<8x64xf32>, vector<8x64xf32>, vector<8x64xf32> -> vector<8x256xf32>
    %c0_24 = arith.constant 0 : index
    %c0_25 = arith.constant 0 : index
    %76 = vector.load %arg3[%c0_24, %c0_25] : memref<256x256xf32, #tpu.memory_space<vmem>>, vector<256x256xf32>
    %cst_26 = arith.constant dense<0.000000e+00> : vector<8x256xf32>
    %77 = tpu.matmul %75, %76, %cst_26 {dimension_numbers = #tpu.dot_dimension_numbers<[1], [0], [0], [1], [0, 0, 1, 1], [], []>} : vector<8x256xf32>, vector<256x256xf32>, vector<8x256xf32> -> vector<8x256xf32>
    %c0_27 = arith.constant 0 : index
    %c0_28 = arith.constant 0 : index
    %78 = vector.load %arg4[%c0_27, %c0_28] : memref<1x256xf32, #tpu.memory_space<vmem>>, vector<1x256xf32>
    %79 = vector.broadcast %78 : vector<1x256xf32> to vector<8x256xf32>
    %80 = arith.addf %77, %79 : vector<8x256xf32>
    %81 = arith.addf %1, %80 : vector<8x256xf32>
    %c0_29 = arith.constant 0 : index
    %c0_30 = arith.constant 0 : index
    %82 = vector.load %arg5[%c0_29, %c0_30] : memref<1x256xf32, #tpu.memory_space<vmem>>, vector<1x256xf32>
    %c0_31 = arith.constant 0 : index
    %c0_32 = arith.constant 0 : index
    %83 = vector.load %arg6[%c0_31, %c0_32] : memref<1x256xf32, #tpu.memory_space<vmem>>, vector<1x256xf32>
    %cst_33 = arith.constant dense<0.000000e+00> : vector<8xf32>
    %84 = vector.multi_reduction <add>, %81, %cst_33 [1] : vector<8x256xf32> to vector<8xf32>
    %85 = vector.shape_cast %84 : vector<8xf32> to vector<8x1xf32>
    %cst_34 = arith.constant 2.560000e+02 : f32
    %86 = vector.broadcast %cst_34 : f32 to vector<8x1xf32>
    %87 = arith.divf %85, %86 : vector<8x1xf32>
    %88 = vector.broadcast %87 : vector<8x1xf32> to vector<8x256xf32>
    %89 = arith.subf %81, %88 : vector<8x256xf32>
    %90 = arith.mulf %89, %89 : vector<8x256xf32>
    %cst_35 = arith.constant dense<0.000000e+00> : vector<8xf32>
    %91 = vector.multi_reduction <add>, %90, %cst_35 [1] : vector<8x256xf32> to vector<8xf32>
    %92 = vector.shape_cast %91 : vector<8xf32> to vector<8x1xf32>
    %cst_36 = arith.constant 0.00392156886 : f32
    %93 = vector.broadcast %cst_36 : f32 to vector<8x1xf32>
    %94 = arith.mulf %92, %93 : vector<8x1xf32>
    %95 = math.sqrt %94 : vector<8x1xf32>
    %cst_37 = arith.constant 1.000000e-03 : f32
    %96 = vector.broadcast %cst_37 : f32 to vector<8x1xf32>
    %97 = arith.addf %95, %96 : vector<8x1xf32>
    %98 = tpu.reciprocal %97 {approx = true} : vector<8x1xf32> -> vector<8x1xf32>
    %99 = vector.broadcast %98 : vector<8x1xf32> to vector<8x256xf32>
    %100 = arith.mulf %89, %99 : vector<8x256xf32>
    %101 = vector.broadcast %82 : vector<1x256xf32> to vector<8x256xf32>
    %102 = arith.mulf %101, %100 : vector<8x256xf32>
    %103 = vector.broadcast %83 : vector<1x256xf32> to vector<8x256xf32>
    %104 = arith.addf %102, %103 : vector<8x256xf32>
    %c0_38 = arith.constant 0 : index
    %c0_39 = arith.constant 0 : index
    %105 = vector.load %arg7[%c0_38, %c0_39] : memref<256x256xf32, #tpu.memory_space<vmem>>, vector<256x256xf32>
    %cst_40 = arith.constant dense<0.000000e+00> : vector<8x256xf32>
    %106 = tpu.matmul %104, %105, %cst_40 {dimension_numbers = #tpu.dot_dimension_numbers<[1], [0], [0], [1], [0, 0, 1, 1], [], []>} : vector<8x256xf32>, vector<256x256xf32>, vector<8x256xf32> -> vector<8x256xf32>
    %c0_41 = arith.constant 0 : index
    %c0_42 = arith.constant 0 : index
    %107 = vector.load %arg8[%c0_41, %c0_42] : memref<1x256xf32, #tpu.memory_space<vmem>>, vector<1x256xf32>
    %108 = vector.broadcast %107 : vector<1x256xf32> to vector<8x256xf32>
    %109 = arith.addf %106, %108 : vector<8x256xf32>
    %cst_43 = arith.constant 0.000000e+00 : f32
    %110 = vector.broadcast %cst_43 : f32 to vector<8x256xf32>
    %111 = arith.maximumf %109, %110 : vector<8x256xf32>
    %c0_44 = arith.constant 0 : index
    %c0_45 = arith.constant 0 : index
    %112 = vector.load %arg9[%c0_44, %c0_45] : memref<256x256xf32, #tpu.memory_space<vmem>>, vector<256x256xf32>
    %cst_46 = arith.constant dense<0.000000e+00> : vector<8x256xf32>
    %113 = tpu.matmul %111, %112, %cst_46 {dimension_numbers = #tpu.dot_dimension_numbers<[1], [0], [0], [1], [0, 0, 1, 1], [], []>} : vector<8x256xf32>, vector<256x256xf32>, vector<8x256xf32> -> vector<8x256xf32>
    %c0_47 = arith.constant 0 : index
    %c0_48 = arith.constant 0 : index
    %114 = vector.load %arg10[%c0_47, %c0_48] : memref<1x256xf32, #tpu.memory_space<vmem>>, vector<1x256xf32>
    %115 = vector.broadcast %114 : vector<1x256xf32> to vector<8x256xf32>
    %116 = arith.addf %113, %115 : vector<8x256xf32>
    %117 = arith.addf %104, %116 : vector<8x256xf32>
    %c0_49 = arith.constant 0 : index
    %c0_50 = arith.constant 0 : index
    %118 = vector.load %arg11[%c0_49, %c0_50] : memref<1x256xf32, #tpu.memory_space<vmem>>, vector<1x256xf32>
    %c0_51 = arith.constant 0 : index
    %c0_52 = arith.constant 0 : index
    %119 = vector.load %arg12[%c0_51, %c0_52] : memref<1x256xf32, #tpu.memory_space<vmem>>, vector<1x256xf32>
    %cst_53 = arith.constant dense<0.000000e+00> : vector<8xf32>
    %120 = vector.multi_reduction <add>, %117, %cst_53 [1] : vector<8x256xf32> to vector<8xf32>
    %121 = vector.shape_cast %120 : vector<8xf32> to vector<8x1xf32>
    %cst_54 = arith.constant 2.560000e+02 : f32
    %122 = vector.broadcast %cst_54 : f32 to vector<8x1xf32>
    %123 = arith.divf %121, %122 : vector<8x1xf32>
    %124 = vector.broadcast %123 : vector<8x1xf32> to vector<8x256xf32>
    %125 = arith.subf %117, %124 : vector<8x256xf32>
    %126 = arith.mulf %125, %125 : vector<8x256xf32>
    %cst_55 = arith.constant dense<0.000000e+00> : vector<8xf32>
    %127 = vector.multi_reduction <add>, %126, %cst_55 [1] : vector<8x256xf32> to vector<8xf32>
    %128 = vector.shape_cast %127 : vector<8xf32> to vector<8x1xf32>
    %cst_56 = arith.constant 0.00392156886 : f32
    %129 = vector.broadcast %cst_56 : f32 to vector<8x1xf32>
    %130 = arith.mulf %128, %129 : vector<8x1xf32>
    %131 = math.sqrt %130 : vector<8x1xf32>
    %cst_57 = arith.constant 1.000000e-03 : f32
    %132 = vector.broadcast %cst_57 : f32 to vector<8x1xf32>
    %133 = arith.addf %131, %132 : vector<8x1xf32>
    %134 = tpu.reciprocal %133 {approx = true} : vector<8x1xf32> -> vector<8x1xf32>
    %135 = vector.broadcast %134 : vector<8x1xf32> to vector<8x256xf32>
    %136 = arith.mulf %125, %135 : vector<8x256xf32>
    %137 = vector.broadcast %118 : vector<1x256xf32> to vector<8x256xf32>
    %138 = arith.mulf %137, %136 : vector<8x256xf32>
    %139 = vector.broadcast %119 : vector<1x256xf32> to vector<8x256xf32>
    %140 = arith.addf %138, %139 : vector<8x256xf32>
    %141 = vector.extract_strided_slice %140 {offsets = [0, 0], sizes = [1, 256], strides = [1, 1]} : vector<8x256xf32> to vector<1x256xf32>
    %c0_58 = arith.constant 0 : index
    %c0_59 = arith.constant 0 : index
    %142 = vector.load %arg13[%c0_58, %c0_59] : memref<256x19xf32, #tpu.memory_space<vmem>>, vector<256x19xf32>
    %cst_60 = arith.constant dense<0.000000e+00> : vector<1x19xf32>
    %143 = tpu.matmul %141, %142, %cst_60 {dimension_numbers = #tpu.dot_dimension_numbers<[1], [0], [0], [1], [0, 0, 1, 1], [], []>} : vector<1x256xf32>, vector<256x19xf32>, vector<1x19xf32> -> vector<1x19xf32>
    %c0_61 = arith.constant 0 : index
    %c0_62 = arith.constant 0 : index
    %144 = vector.load %arg14[%c0_61, %c0_62] : memref<1x19xf32, #tpu.memory_space<vmem>>, vector<1x19xf32>
    %145 = arith.addf %143, %144 : vector<1x19xf32>
    %c0_63 = arith.constant 0 : index
    %c0_64 = arith.constant 0 : index
    %c0_65 = arith.constant 0 : index
    %146 = vector.load %arg15[%c0_63, %c0_64, %c0_65] : memref<1x1x19xf32, #tpu.memory_space<vmem>>, vector<1x1x19xf32>
    %147 = vector.shape_cast %146 : vector<1x1x19xf32> to vector<1x19xf32>
    %148 = vector.shape_cast %145 : vector<1x19xf32> to vector<1x1x19xf32>
    tpu.vector_store %arg15[%c0_63, %c0_64, %c0_65], %148 {strides = array<i32>} : memref<1x1x19xf32, #tpu.memory_space<vmem>>, vector<1x1x19xf32>,
    return
  }
  func.func @transform_0(%arg0: i32) -> (i32, i32, i32) {
    %c0_i32 = arith.constant 0 : i32
    %c0_i32_0 = arith.constant 0 : i32
    %c0_i32_1 = arith.constant 0 : i32
    return %arg0, %c0_i32, %c0_i32_0 : i32, i32, i32
  }
  func.func @transform_1(%arg0: i32) -> (i32, i32) {
    %c0_i32 = arith.constant 0 : i32
    %c0_i32_0 = arith.constant 0 : i32
    %c0_i32_1 = arith.constant 0 : i32
    return %c0_i32, %c0_i32_0 : i32, i32
  }
  func.func @transform_2(%arg0: i32) -> (i32, i32) {
    %c0_i32 = arith.constant 0 : i32
    %c0_i32_0 = arith.constant 0 : i32
    %c0_i32_1 = arith.constant 0 : i32
    return %c0_i32, %c0_i32_0 : i32, i32
  }
  func.func @transform_3(%arg0: i32) -> (i32, i32) {
    %c0_i32 = arith.constant 0 : i32
    %c0_i32_0 = arith.constant 0 : i32
    %c0_i32_1 = arith.constant 0 : i32
    return %c0_i32, %c0_i32_0 : i32, i32
  }
  func.func @transform_4(%arg0: i32) -> (i32, i32) {
    %c0_i32 = arith.constant 0 : i32
    %c0_i32_0 = arith.constant 0 : i32
    %c0_i32_1 = arith.constant 0 : i32
    return %c0_i32, %c0_i32_0 : i32, i32
  }
  func.func @transform_5(%arg0: i32) -> (i32, i32) {
    %c0_i32 = arith.constant 0 : i32
    %c0_i32_0 = arith.constant 0 : i32
    %c0_i32_1 = arith.constant 0 : i32
    return %c0_i32, %c0_i32_0 : i32, i32
  }
  func.func @transform_6(%arg0: i32) -> (i32, i32) {
    %c0_i32 = arith.constant 0 : i32
    %c0_i32_0 = arith.constant 0 : i32
    %c0_i32_1 = arith.constant 0 : i32
    return %c0_i32, %c0_i32_0 : i32, i32
  }
  func.func @transform_7(%arg0: i32) -> (i32, i32) {
    %c0_i32 = arith.constant 0 : i32
    %c0_i32_0 = arith.constant 0 : i32
    %c0_i32_1 = arith.constant 0 : i32
    return %c0_i32, %c0_i32_0 : i32, i32
  }
  func.func @transform_8(%arg0: i32) -> (i32, i32) {
    %c0_i32 = arith.constant 0 : i32
    %c0_i32_0 = arith.constant 0 : i32
    %c0_i32_1 = arith.constant 0 : i32
    return %c0_i32, %c0_i32_0 : i32, i32
  }
  func.func @transform_9(%arg0: i32) -> (i32, i32) {
    %c0_i32 = arith.constant 0 : i32
    %c0_i32_0 = arith.constant 0 : i32
    %c0_i32_1 = arith.constant 0 : i32
    return %c0_i32, %c0_i32_0 : i32, i32
  }
  func.func @transform_10(%arg0: i32) -> (i32, i32) {
    %c0_i32 = arith.constant 0 : i32
    %c0_i32_0 = arith.constant 0 : i32
    %c0_i32_1 = arith.constant 0 : i32
    return %c0_i32, %c0_i32_0 : i32, i32
  }
  func.func @transform_11(%arg0: i32) -> (i32, i32) {
    %c0_i32 = arith.constant 0 : i32
    %c0_i32_0 = arith.constant 0 : i32
    %c0_i32_1 = arith.constant 0 : i32
    return %c0_i32, %c0_i32_0 : i32, i32
  }
  func.func @transform_12(%arg0: i32) -> (i32, i32) {
    %c0_i32 = arith.constant 0 : i32
    %c0_i32_0 = arith.constant 0 : i32
    %c0_i32_1 = arith.constant 0 : i32
    return %c0_i32, %c0_i32_0 : i32, i32
  }
  func.func @transform_13(%arg0: i32) -> (i32, i32) {
    %c0_i32 = arith.constant 0 : i32
    %c0_i32_0 = arith.constant 0 : i32
    %c0_i32_1 = arith.constant 0 : i32
    return %c0_i32, %c0_i32_0 : i32, i32
  }
  func.func @transform_14(%arg0: i32) -> (i32, i32, i32) {
    %c0_i32 = arith.constant 0 : i32
    %c0_i32_0 = arith.constant 0 : i32
    %c0_i32_1 = arith.constant 0 : i32
    return %arg0, %c0_i32, %c0_i32_0 : i32, i32, i32
  }
}

</mosaic_0001>

<bundles_post_ra>
// kernel: transformer_forward.1
= control target key start
LH: loop header
LB: loop body
LE: loop exit
PB: predicated region body
PF: predicated region fallthrough
CT: control target
= control target key end

     0   :  { %s3772_s0 = inlined_call_operand.vmem [shape: f32[2,8,256], index: 0, kind: input, shape index: {}]   ;;  %s3773_s1 = inlined_call_operand.hbm [shape: f32[256,768], index: 1, kind: input, shape index: {}]   ;;  %s3774_s2 = inlined_call_operand.hbm [shape: f32[256,256], index: 2, kind: input, shape index: {}]   ;;  %s3775_s3 = inlined_call_operand.vmem [shape: f32[1,256], index: 3, kind: input, shape index: {}]   ;;  %s3776_s4 = inlined_call_operand.vmem [shape: f32[1,256], index: 4, kind: input, shape index: {}]   ;;  %s3777_s5 = inlined_call_operand.vmem [shape: f32[1,256], index: 5, kind: input, shape index: {}]   ;;  %s3778_s6 = inlined_call_operand.hbm [shape: f32[256,256], index: 6, kind: input, shape index: {}]   ;;  %s3779_s7 = inlined_call_operand.vmem [shape: f32[1,256], index: 7, kind: input, shape index: {}]   ;;  %s3780_s8 = inlined_call_operand.hbm [shape: f32[256,256], index: 8, kind: input, shape index: {}]   ;;  %s3781_s9 = inlined_call_operand.vmem [shape: f32[1,256], index: 9, kind: input, shape index: {}]   ;;  %s3782_s10 = inlined_call_operand.vmem [shape: f32[1,256], index: 10, kind: input, shape index: {}]   ;;  %s3783_s11 = inlined_call_operand.vmem [shape: f32[1,256], index: 11, kind: input, shape index: {}]   ;;  %s3784_s12 = inlined_call_operand.vmem [shape: f32[256,19], index: 12, kind: input, shape index: {}]   ;;  %s3785_s13 = inlined_call_operand.vmem [shape: f32[1,19], index: 13, kind: input, shape index: {}]   ;;  %s3786_s14 = inlined_call_operand.hbm [shape: f32[2,1,19], index: 14, kind: output, shape index: {}]  }
   0x1   :  { %3803 = sst [smem:[#allocation22_spill]] %s3774_s2 }
   0x2   :  { %3804 = sst [smem:[#allocation23_spill]] %s3785_s13 }
   0x3   :  { %3805 = sst [smem:[#allocation24_spill]] %s3786_s14 }
   0x4   :  { %19 = vsyncpa [#allocation3], 0 }
   0x5   :  { %20 = vsyncpa [#allocation6], 0 }
   0x6   :  { %21 = vsyncpa [#allocation9], 0 }
   0x7   :  { %22 = vsyncpa [#allocation4], 0 }
   0x8   :  { %24 = vsyncpa [#allocation4 + $0x1], 0  ;;  %s3291_s29 = smov 0   ;;  %s3293_s30 = smov 0  }
   0x9   :  { %s3295_s15 = smov 0   ;;  %s3297_s16 = smov 0  }
   0xa LB: > { %3806 = sst [smem:[#allocation15_spill]] %s3190_s29  ;;  %s3312_s17 = sadd.s32 4294967295, %s3202_s16   ;;  %s3202_s16 = sphi %s3297_s16, %s3836_s16   ;;  %s3198_s15 = sphi %s3295_s15, %s3838_s15   ;;  %s3194_s30 = sphi %s3293_s30, %s3840_s30   ;;  %s3190_s29 = sphi %s3291_s29, %s3839_s29  }
   0xb   : > { %3807 = sst [smem:[#allocation16_spill]] %s3198_s15  ;;  %s2363_s18 = sadd.s32 4294967294, %s3202_s16  }
   0xc   : > { %3808 = sst [smem:[#allocation17_spill]] %s3202_s16  ;;  %s3316_s19 = sadd.s32 1, %s3202_s16  }
   0xd   : > { %3809 = sst [smem:[#allocation18_spill]] %s3316_s19  ;;  %s336_s20 = sadd.s32 1, %s3198_s15 }
   0xe   : > { %s333_s21 = ssub.s32 %s3202_s16, %s3316_s19  ;;  %p346_p0 = scmp.ne.s32.totalorder %s3198_s15, %s3194_s30 }
   0xf   : > { %p334_p1 = scmp.eq.s32.totalorder %s333_s21, 0  ;;  %p347_p2 = scmp.eq.s32.totalorder %s3312_s17, 1 }
  0x10   : > { %p352_p3 = scmp.ne.s32.totalorder %s3194_s30, %s3190_s29  ;;  %p353_p4 = scmp.eq.s32.totalorder %s2363_s18, 1 }
  0x11   : > { %s3327_s22 = scalar_select %p334_p1, %s3198_s15, %s336_s20  }
  0x12   : > { %p3329_p5 = por %p347_p2, %p346_p0  ;;  %p3333_p6 = por %p353_p4, %p352_p3 }
  0x13   : > { %3810 = sst [smem:[#allocation19_spill]] %s3327_s22  ;;  %p2364_p7 = scmp.ge.s32.totalorder %s3202_s16, 1 }
  0x14   : > { %s3811_s23 = scalar_select %p3329_p5, 1, 0 }
  0x15   : > { %s3813_s24 = scalar_select %p3333_p6, 1, 0 }
  0x16   : > { %3812 = sst [smem:[#allocation20_spill]] %s3811_s23  ;;  %p360_p8 = scmp.lt.s32.totalorder %s3202_s16, 3 }
  0x17   : > { %3814 = sst [smem:[#allocation21_spill]] %s3813_s24  ;;  %p3792_p9 = scmp.eq.s32.totalorder %s3312_s17, 0 }
  0x18   : > { %p3340_p10 = pnand %p2364_p7, %p360_p8  ;;  %s3204_s26 = smov [#allocation5]  }
  0x19   : > { %s385_s27 = sshll.u32 %s3204_s26, 4  ;;  %s3205_s18 = smov [#allocation2]   ;;  %s386_s27 = int_to_ptr.vmem [resolvable:$true] %s385_s27 }
  0x1a   : > { %s3815_s25 = scalar_select %p3340_p10, 1, 0 }
  0x1b   : > { %p2918_p11 = pneg %p3340_p10  ;;  %s372_s20 = sshll.u32 %s3205_s18, 4  ;;  %s3352_s20 = int_to_ptr.vmem [resolvable:$true] %s372_s20 }
  0x1c   : > { %s3817_s2 = sld [smem:[#allocation22_spill]] }
  0x1d   : > { %p3348_p12 = pnand %p3792_p9, %p2918_p11 }
  0x1f   : > { %p3362_p0 = pneg %p3348_p12 }
  0x22   : > { %s3016_s15 = scalar_lea.hbm %s3817_s2, 8192 }
  0x23   : > { %p3017_p13 = scmp.ne.s32.totalorder %s3817_s2, %s3016_s15  ;;  %p3023_p3 = scmp.lt.u32.totalorder %s3016_s15, %s3817_s2 }
  0x25   : > { %p3019_p1 = pnand %p3362_p0, %p3017_p13 }
  0x27   : > { %p3020_p2 = pneg %p3019_p1 }
  0x29   : > { %p3025_p4 = pnand %p3023_p3, %p3020_p2 }
  0x2b   : > { %3028 = shalt.err (!%p3025_p4)
}
  0x2c   : > { %s3029_s22 = scalar_lea.vmem %s386_s27, 8192  ;;  %p3037_p9 = scmp.lt.s32.totalorder %s386_s27, %s386_s27 }
  0x2d   : > { %p3030_p7 = scmp.ne.s32.totalorder %s386_s27, %s3029_s22  ;;  %p3038_p6 = scmp.lt.s32.totalorder %s3029_s22, %s3029_s22 }
  0x2f   : > { %p3032_p8 = pnand %p3030_p7, %p3362_p0  ;;  %p3039_p5 = por %p3038_p6, %p3037_p9 }
  0x31   : > { %p3033_p11 = pneg %p3032_p8 }
  0x33   : > { %p3040_p10 = pnand %p3039_p5, %p3033_p11 }
  0x35   : > { %3043 = shalt.err (!%p3040_p10)
}
  0x36   : > { %s3799_s19 = smov 256   ;;  %s3801_s24 = smov 16  }
  0x37   : > { %2924 = dma.hbm_to_vmem [thread:$0]  (!%p3348_p12), %s3817_s2, 8192, %s386_s27, [#allocation6], %s3799_s19, %s3799_s19, %s3801_s24  }
  0x38   : > { %s3044_s16 = scalar_lea.hbm %s3773_s1, 24576 }
  0x39   : > { %p3045_p5 = scmp.ne.s32.totalorder %s3773_s1, %s3044_s16  ;;  %p3051_p10 = scmp.lt.u32.totalorder %s3044_s16, %s3773_s1 }
  0x3b   : > { %p3047_p6 = pnand %p3045_p5, %p3362_p0 }
  0x3d   : > { %p3048_p9 = pneg %p3047_p6 }
  0x3f   : > { %p3053_p13 = pnand %p3051_p10, %p3048_p9 }
  0x41   : > { %3056 = shalt.err (!%p3053_p13)
}
  0x42   : > { %s3057_s27 = scalar_lea.vmem %s3352_s20, 24576  ;;  %p3065_p4 = scmp.lt.s32.totalorder %s3352_s20, %s3352_s20 }
  0x43   : > { %p3058_p1 = scmp.ne.s32.totalorder %s3352_s20, %s3057_s27  ;;  %p3066_p7 = scmp.lt.s32.totalorder %s3057_s27, %s3057_s27 }
  0x45   : > { %p3060_p2 = pnand %p3058_p1, %p3362_p0  ;;  %p3067_p8 = por %p3066_p7, %p3065_p4 }
  0x47   : > { %p3061_p3 = pneg %p3060_p2 }
  0x49   : > { %p3068_p11 = pnand %p3067_p8, %p3061_p3 }
  0x4b   : > { %3071 = shalt.err (!%p3068_p11)
}
  0x4c   : > { %s3208_s14 = smov 768   ;;  %s3209_s13 = smov 48  }
  0x4d   : > { %2921 = dma.hbm_to_vmem [thread:$0]  (!%p3348_p12), %s3773_s1, 24576, %s3352_s20, [#allocation3], %s3208_s14, %s3208_s14, %s3209_s13  }
  0x4e   : > { %s3210_s29 = smov [#allocation7]   ;;  %s3211_s21 = smov [#allocation8]  }
  0x4f   : > { %s407_s15 = sshll.u32 %s3210_s29, 4  ;;  %s423_s18 = sshll.u32 %s3211_s21, 4  ;;  %s408_s15 = int_to_ptr.vmem [resolvable:$true] %s407_s15  ;;  %s3404_s18 = int_to_ptr.vmem [resolvable:$true] %s423_s18 }
  0x50   : > { %s3072_s19 = scalar_lea.hbm %s3778_s6, 8192 }
  0x51   : > { %p3073_p5 = scmp.ne.s32.totalorder %s3778_s6, %s3072_s19  ;;  %p3079_p10 = scmp.lt.u32.totalorder %s3072_s19, %s3778_s6 }
  0x53   : > { %p3075_p6 = pnand %p3073_p5, %p3362_p0 }
  0x55   : > { %p3076_p9 = pneg %p3075_p6 }
  0x57   : > { %p3081_p13 = pnand %p3079_p10, %p3076_p9 }
  0x59   : > { %3084 = shalt.err (!%p3081_p13)
}
  0x5a   : > { %s3085_s14 = scalar_lea.vmem %s408_s15, 8192  ;;  %p3093_p4 = scmp.lt.s32.totalorder %s408_s15, %s408_s15 }
  0x5b   : > { %p3086_p1 = scmp.ne.s32.totalorder %s408_s15, %s3085_s14  ;;  %p3094_p7 = scmp.lt.s32.totalorder %s3085_s14, %s3085_s14 }
  0x5d   : > { %p3088_p2 = pnand %p3086_p1, %p3362_p0  ;;  %p3095_p8 = por %p3094_p7, %p3093_p4 }
  0x5f   : > { %p3089_p3 = pneg %p3088_p2 }
  0x61   : > { %p3096_p11 = pnand %p3095_p8, %p3089_p3 }
  0x63   : > { %3099 = shalt.err (!%p3096_p11)
}
  0x64   : > { %s3819_s2 = smov 16   ;;  %s3820_s24 = smov 256  }
  0x65   : > { %2927 = dma.hbm_to_vmem [thread:$0]  (!%p3348_p12), %s3778_s6, 8192, %s408_s15, [#allocation6], %s3820_s24, %s3820_s24, %s3819_s2  }
  0x66   : > { %s3100_s21 = scalar_lea.hbm %s3780_s8, 8192 }
  0x67   : > { %p3101_p5 = scmp.ne.s32.totalorder %s3780_s8, %s3100_s21  ;;  %p3107_p10 = scmp.lt.u32.totalorder %s3100_s21, %s3780_s8 }
  0x69   : > { %p3103_p6 = pnand %p3101_p5, %p3362_p0 }
  0x6b   : > { %p3104_p9 = pneg %p3103_p6 }
  0x6d   : > { %p3109_p13 = pnand %p3107_p10, %p3104_p9 }
  0x6f   : > { %3112 = shalt.err (!%p3109_p13)
}
  0x70   : > { %s3113_s15 = scalar_lea.vmem %s3404_s18, 8192  ;;  %p3121_p4 = scmp.lt.s32.totalorder %s3404_s18, %s3404_s18 }
  0x71   : > { %p3114_p1 = scmp.ne.s32.totalorder %s3404_s18, %s3113_s15  ;;  %p3122_p7 = scmp.lt.s32.totalorder %s3113_s15, %s3113_s15 }
  0x73   : > { %p3116_p2 = pnand %p3114_p1, %p3362_p0  ;;  %p3123_p8 = por %p3122_p7, %p3121_p4 }
  0x75   : > { %p3117_p3 = pneg %p3116_p2 }
  0x77   : > { %p3124_p11 = pnand %p3123_p8, %p3117_p3 }
  0x79   : > { %3127 = shalt.err (!%p3124_p11)
}
  0x7a   : > { %2930 = dma.hbm_to_vmem [thread:$0]  (!%p3348_p12), %s3780_s8, 8192, %s3404_s18, [#allocation9], %s3820_s24, %s3820_s24, %s3819_s2  }
  0x7b   : > { %p3821_p5 = scmp.ne.s32.totalorder %s3815_s25, 0 }
  0x7c   : > { %p3822_p0 = scmp.eq.s32.totalorder (!%p3821_p5), %s3312_s17, 0 }
  0x7d   : > { %462 = sbr.rel (%p3821_p5) target bundleno = 4423 (0x1147), region = 76 }
  0x84   : > { %3173 = dma.done.wait (%p3822_p0), [#allocation3], 24576   ;;  %p3823_p6 = pmov %p3822_p0 }
  0x85   : > { %p3824_p9 = pmov %p3822_p0 }
  0x86   : > { %3175 = vsyncadd (%p3823_p6), [#allocation3], 4294942720 }
  0x87   : > { %3177 = dma.done.wait (%p3824_p9), [#allocation6], 16384   ;;  %p3825_p10 = pmov %p3822_p0 }
  0x88   : > { %p3826_p13 = pmov %p3822_p0 }
  0x89   : > { %3179 = vsyncadd (%p3825_p10), [#allocation6], 4294950912 }
  0x8a   : > { %3181 = dma.done.wait (%p3826_p13), [#allocation9], 8192   ;;  %p3827_p12 = pmov %p3822_p0 }
  0x8b   : > { %v529_v0 = vld [vmem:[#allocation2 + $0x18] sm:$0xff]  ;;  %v535_v1 = vld [vmem:[#allocation2 + $0x48] sm:$0xff]  ;;  %v528_v2 = vld [vmem:[#allocation2 + $0x10] sm:$0xff]  ;;  %p519_p1 = scmp.lt.s32.totalorder %s3312_s17, 1  ;;  %vm3213_vm0 = vmmov 0   ;;  %vm931_vm1 = vcmask 523264  }
  0x8c   : > { %3183 = vsyncadd (%p3827_p12), [#allocation9], 4294959104  ;;  %v2548_v3 = vpack.c.bf16 %v535_v1, %v529_v0  ;;  %v534_v4 = vld [vmem:[#allocation2 + $0x40] sm:$0xff]  ;;  %v527_v5 = vld [vmem:[#allocation2 + $0x8] sm:$0xff]  ;;  %s3214_s24 = smov 64   ;;  %vm1009_vm2 = vcmask 64512  }
  0x8d   : > { %v533_v6 = vld [vmem:[#allocation2 + $0x38] sm:$0xff]  ;;  %v2550_v7 = vpack.c.bf16 %v534_v4, %v528_v2  ;;  %v526_v9 = vld [vmem:[#allocation2] sm:$0xff]  ;;  %v532_v10 = vld [vmem:[#allocation2 + $0x30] sm:$0xff]  ;;  %s3471_s25 = scalar_select %p519_p1, %s3312_s17, 1  ;;  %vm2252_vm7 = vcmask 147456  }
  0x8e   : > { %v2484_v8 = vpack.c.bf16 %v533_v6, %v527_v5  ;;  %v541_v11 = vld [vmem:[#allocation2 + $0x78] sm:$0xff]  ;;  %2549 = vmatprep.subr.bf16.mxu1 %v2548_v3  ;;  %v2486_v12 = vpack.c.bf16 %v532_v10, %v526_v9  ;;  %v547_v13 = vld [vmem:[#allocation2 + $0xa8] sm:$0xff]  ;;  %v540_v14 = vld [vmem:[#allocation2 + $0x70] sm:$0xff]  ;;  %s517_s13 = sand.u32 1, %s3194_s30   ;;  %s3829_s18 = sld [smem:[#allocation23_spill]] }
  0x8f   : > { %v546_v15 = vld [vmem:[#allocation2 + $0xa0] sm:$0xff]  ;;  %2551 = vmatpush1.bf16.msra.mxu1 %v2550_v7  ;;  %v2552_v16 = vpack.c.bf16 %v547_v13, %v541_v11  ;;  %v539_v18 = vld [vmem:[#allocation2 + $0x68] sm:$0xff]  ;;  %v545_v19 = vld [vmem:[#allocation2 + $0x98] sm:$0xff]  ;;  %s2392_s28 = sshll.u32 %s3471_s25, 4  ;;  %s3828_s25 = sld [smem:[#allocation20_spill]] }
  0x90   : > { %2485 = vmatprep.subr.bf16.mxu0 %v2484_v8  ;;  %v2554_v17 = vpack.c.bf16 %v546_v15, %v540_v14  ;;  %v538_v20 = vld [vmem:[#allocation2 + $0x60] sm:$0xff]  ;;  %v2488_v21 = vpack.c.bf16 %v545_v19, %v539_v18  ;;  %v544_v22 = vld [vmem:[#allocation2 + $0x90] sm:$0xff]  ;;  %v553_v23 = vld [vmem:[#allocation2 + $0xd8] sm:$0xff]  ;;  %s3477_s2 = scalar_lea.vmem %s3772_s0, %s2392_s28  ;;  %s3830_s21 = sld [smem:[#allocation24_spill]] }
  0x91   : > { %2487 = vmatpush1.bf16.msra.mxu0 %v2486_v12  ;;  %v559_v24 = vld [vmem:[#allocation2 + $0x108] sm:$0xff]  ;;  %2553 = vmatprep.subr.bf16.mxu1 %v2552_v16  ;;  %v2490_v25 = vpack.c.bf16 %v544_v22, %v538_v20  ;;  %v552_v27 = vld [vmem:[#allocation2 + $0xd0] sm:$0xff]  ;;  %v558_v28 = vld [vmem:[#allocation2 + $0x100] sm:$0xff]  ;;  %s2255_s27 = scalar_lea.sflag [#allocation4], %s517_s13 }
  0x92   : > { %v2556_v26 = vpack.c.bf16 %v559_v24, %v553_v23  ;;  %v551_v29 = vld [vmem:[#allocation2 + $0xc8] sm:$0xff]  ;;  %2489 = vmatprep.subr.bf16.mxu0 %v2488_v21  ;;  %v557_v30 = vld [vmem:[#allocation2 + $0xf8] sm:$0xff]  ;;  %v550_v31 = vld [vmem:[#allocation2 + $0xc0] sm:$0xff]  ;;  %v2558_v33 = vpack.c.bf16 %v558_v28, %v552_v27 }
  0x93   : > { %v556_v32 = vld [vmem:[#allocation2 + $0xf0] sm:$0xff]  ;;  %2555 = vmatpush1.bf16.msra.mxu1 %v2554_v17  ;;  %v2492_v34 = vpack.c.bf16 %v557_v30, %v551_v29  ;;  %v565_v35 = vld [vmem:[#allocation2 + $0x138] sm:$0xff]  ;;  %v571_v36 = vld [vmem:[#allocation2 + $0x168] sm:$0xff] }
  0x94   : > { %v564_v37 = vld [vmem:[#allocation2 + $0x130] sm:$0xff]  ;;  %2557 = vmatprep.subr.bf16.mxu1 %v2556_v26  ;;  %v2494_v38 = vpack.c.bf16 %v556_v32, %v550_v31  ;;  %v2560_v39 = vpack.c.bf16 %v571_v36, %v565_v35  ;;  %v570_v40 = vld [vmem:[#allocation2 + $0x160] sm:$0xff]  ;;  %v563_v41 = vld [vmem:[#allocation2 + $0x128] sm:$0xff] }
  0x95   : > { %2491 = vmatpush1.bf16.msra.mxu0 %v2490_v25  ;;  %v569_v42 = vld [vmem:[#allocation2 + $0x158] sm:$0xff]  ;;  %v562_v44 = vld [vmem:[#allocation2 + $0x120] sm:$0xff]  ;;  %v568_v45 = vld [vmem:[#allocation2 + $0x150] sm:$0xff]  ;;  %v2562_v48 = vpack.c.bf16 %v570_v40, %v564_v37  ;;  %p3831_p3 = scmp.ne.s32.totalorder %s3828_s25, 0 }
  0x96   : > { %2493 = vmatprep.subr.bf16.mxu0 %v2492_v34  ;;  %v2496_v43 = vpack.c.bf16 %v569_v42, %v563_v41  ;;  %v577_v46 = vld [vmem:[#allocation2 + $0x198] sm:$0xff]  ;;  %v583_v47 = vld [vmem:[#allocation2 + $0x1c8] sm:$0xff]  ;;  %v2498_v51 = vpack.c.bf16 %v568_v45, %v562_v44  ;;  %v576_v53 = vld [vmem:[#allocation2 + $0x190] sm:$0xff] }
  0x97   : > { %2559 = vmatpush1.bf16.msra.mxu1 %v2558_v33  ;;  %v575_v49 = vld [vmem:[#allocation2 + $0x188] sm:$0xff]  ;;  %v581_v50 = vld [vmem:[#allocation2 + $0x1b8] sm:$0xff]  ;;  %v2564_v52 = vpack.c.bf16 %v583_v47, %v577_v46  ;;  %v582_v54 = vld [vmem:[#allocation2 + $0x1c0] sm:$0xff] }
  0x98   : > { %2561 = vmatprep.subr.bf16.mxu1 %v2560_v39  ;;  %v574_v55 = vld [vmem:[#allocation2 + $0x180] sm:$0xff]  ;;  %v2500_v56 = vpack.c.bf16 %v581_v50, %v575_v49  ;;  %v580_v57 = vld [vmem:[#allocation2 + $0x1b0] sm:$0xff]  ;;  %v589_v58 = vld [vmem:[#allocation2 + $0x1f8] sm:$0xff]  ;;  %v2566_v62 = vpack.c.bf16 %v582_v54, %v576_v53 }
  0x99   : > { %2495 = vmatpush1.bf16.msra.mxu0 %v2494_v38  ;;  %v595_v59 = vld [vmem:[#allocation2 + $0x228] sm:$0xff]  ;;  %v593_v61 = vld [vmem:[#allocation2 + $0x218] sm:$0xff]  ;;  %v2502_v63 = vpack.c.bf16 %v580_v57, %v574_v55  ;;  %v588_v1 = vld [vmem:[#allocation2 + $0x1f0] sm:$0xff] }
  0x9a   : > { %2497 = vmatprep.subr.bf16.mxu0 %v2496_v43  ;;  %v587_v60 = vld [vmem:[#allocation2 + $0x1e8] sm:$0xff]  ;;  %v2568_v0 = vpack.c.bf16 %v595_v59, %v589_v58  ;;  %v594_v2 = vld [vmem:[#allocation2 + $0x220] sm:$0xff]  ;;  %v592_v5 = vld [vmem:[#allocation2 + $0x210] sm:$0xff] }
  0x9b   : > { %2563 = vmatpush1.bf16.msra.mxu1 %v2562_v48  ;;  %v586_v3 = vld [vmem:[#allocation2 + $0x1e0] sm:$0xff]  ;;  %v2504_v4 = vpack.c.bf16 %v593_v61, %v587_v60  ;;  %v601_v6 = vld [vmem:[#allocation2 + $0x258] sm:$0xff]  ;;  %v607_v7 = vld [vmem:[#allocation2 + $0x288] sm:$0xff]  ;;  %v2570_v10 = vpack.c.bf16 %v594_v2, %v588_v1 }
  0x9c   : > { %2565 = vmatprep.subr.bf16.mxu1 %v2564_v52  ;;  %v599_v8 = vld [vmem:[#allocation2 + $0x248] sm:$0xff]  ;;  %v605_v9 = vld [vmem:[#allocation2 + $0x278] sm:$0xff]  ;;  %v2506_v11 = vpack.c.bf16 %v592_v5, %v586_v3  ;;  %v2572_v12 = vpack.c.bf16 %v607_v7, %v601_v6  ;;  %v600_v13 = vld [vmem:[#allocation2 + $0x250] sm:$0xff] }
  0x9d   : > { %2499 = vmatpush1.bf16.msra.mxu0 %v2498_v51  ;;  %v606_v14 = vld [vmem:[#allocation2 + $0x280] sm:$0xff]  ;;  %v2508_v16 = vpack.c.bf16 %v605_v9, %v599_v8  ;;  %v604_v17 = vld [vmem:[#allocation2 + $0x270] sm:$0xff]  ;;  %v613_v18 = vld [vmem:[#allocation2 + $0x2b8] sm:$0xff] }
  0x9e   : > { %2501 = vmatprep.subr.bf16.mxu0 %v2500_v56  ;;  %v598_v15 = vld [vmem:[#allocation2 + $0x240] sm:$0xff]  ;;  %v619_v19 = vld [vmem:[#allocation2 + $0x2e8] sm:$0xff]  ;;  %v617_v21 = vld [vmem:[#allocation2 + $0x2d8] sm:$0xff]  ;;  %v2574_v22 = vpack.c.bf16 %v606_v14, %v600_v13 }
  0x9f   : > { %2567 = vmatpush1.bf16.msra.mxu1 %v2566_v62  ;;  %v611_v20 = vld [vmem:[#allocation2 + $0x2a8] sm:$0xff]  ;;  %v2510_v23 = vpack.c.bf16 %v604_v17, %v598_v15  ;;  %v2576_v24 = vpack.c.bf16 %v619_v19, %v613_v18  ;;  %v612_v25 = vld [vmem:[#allocation2 + $0x2b0] sm:$0xff]  ;;  %v618_v26 = vld [vmem:[#allocation2 + $0x2e0] sm:$0xff] }
  0xa0   : > { %2569 = vmatprep.subr.bf16.mxu1 %v2568_v0  ;;  %v610_v27 = vld [vmem:[#allocation2 + $0x2a0] sm:$0xff]  ;;  %v2512_v28 = vpack.c.bf16 %v617_v21, %v611_v20  ;;  %v616_v29 = vld [vmem:[#allocation2 + $0x2d0] sm:$0xff]  ;;  %v625_v30 = vld [vmem:[#allocation2 + $0x318] sm:$0xff]  ;;  %v2578_v34 = vpack.c.bf16 %v618_v26, %v612_v25 }
  0xa1   : > { %2503 = vmatpush1.bf16.msra.mxu0 %v2502_v63  ;;  %v631_v31 = vld [vmem:[#allocation2 + $0x348] sm:$0xff]  ;;  %v629_v33 = vld [vmem:[#allocation2 + $0x338] sm:$0xff]  ;;  %v2514_v35 = vpack.c.bf16 %v616_v29, %v610_v27  ;;  %v624_v37 = vld [vmem:[#allocation2 + $0x310] sm:$0xff] }
  0xa2   : > { %2505 = vmatprep.subr.bf16.mxu0 %v2504_v4  ;;  %v623_v32 = vld [vmem:[#allocation2 + $0x308] sm:$0xff]  ;;  %v2580_v36 = vpack.c.bf16 %v631_v31, %v625_v30  ;;  %v630_v38 = vld [vmem:[#allocation2 + $0x340] sm:$0xff]  ;;  %v628_v41 = vld [vmem:[#allocation2 + $0x330] sm:$0xff] }
  0xa3   : > { %2571 = vmatpush1.bf16.msra.mxu1 %v2570_v10  ;;  %v622_v39 = vld [vmem:[#allocation2 + $0x300] sm:$0xff]  ;;  %v2516_v40 = vpack.c.bf16 %v629_v33, %v623_v32  ;;  %v637_v42 = vld [vmem:[#allocation2 + $0x378] sm:$0xff]  ;;  %v643_v43 = vld [vmem:[#allocation2 + $0x3a8] sm:$0xff]  ;;  %v2582_v46 = vpack.c.bf16 %v630_v38, %v624_v37 }
  0xa4   : > { %2573 = vmatprep.subr.bf16.mxu1 %v2572_v12  ;;  %v635_v44 = vld [vmem:[#allocation2 + $0x368] sm:$0xff]  ;;  %v641_v45 = vld [vmem:[#allocation2 + $0x398] sm:$0xff]  ;;  %v2518_v47 = vpack.c.bf16 %v628_v41, %v622_v39  ;;  %v2584_v48 = vpack.c.bf16 %v643_v43, %v637_v42  ;;  %v636_v49 = vld [vmem:[#allocation2 + $0x370] sm:$0xff] }
  0xa5   : > { %2507 = vmatpush1.bf16.msra.mxu0 %v2506_v11  ;;  %v642_v50 = vld [vmem:[#allocation2 + $0x3a0] sm:$0xff]  ;;  %v2520_v52 = vpack.c.bf16 %v641_v45, %v635_v44  ;;  %v640_v53 = vld [vmem:[#allocation2 + $0x390] sm:$0xff]  ;;  %v649_v54 = vld [vmem:[#allocation2 + $0x3d8] sm:$0xff] }
  0xa6   : > { %2509 = vmatprep.subr.bf16.mxu0 %v2508_v16  ;;  %v634_v51 = vld [vmem:[#allocation2 + $0x360] sm:$0xff]  ;;  %v655_v55 = vld [vmem:[#allocation2 + $0x408] sm:$0xff]  ;;  %v653_v57 = vld [vmem:[#allocation2 + $0x3f8] sm:$0xff]  ;;  %v2586_v58 = vpack.c.bf16 %v642_v50, %v636_v49 }
  0xa7   : > { %2575 = vmatpush1.bf16.msra.mxu1 %v2574_v22  ;;  %v647_v56 = vld [vmem:[#allocation2 + $0x3c8] sm:$0xff]  ;;  %v2522_v59 = vpack.c.bf16 %v640_v53, %v634_v51  ;;  %v2588_v60 = vpack.c.bf16 %v655_v55, %v649_v54  ;;  %v648_v61 = vld [vmem:[#allocation2 + $0x3d0] sm:$0xff]  ;;  %v654_v62 = vld [vmem:[#allocation2 + $0x400] sm:$0xff] }
  0xa8   : > { %2577 = vmatprep.subr.bf16.mxu1 %v2576_v24  ;;  %v646_v63 = vld [vmem:[#allocation2 + $0x3c0] sm:$0xff]  ;;  %v2524_v0 = vpack.c.bf16 %v653_v57, %v647_v56  ;;  %v652_v1 = vld [vmem:[#allocation2 + $0x3f0] sm:$0xff]  ;;  %v661_v2 = vld [vmem:[#allocation2 + $0x438] sm:$0xff]  ;;  %v2590_v6 = vpack.c.bf16 %v654_v62, %v648_v61 }
  0xa9   : > { %2511 = vmatpush1.bf16.msra.mxu0 %v2510_v23  ;;  %v667_v3 = vld [vmem:[#allocation2 + $0x468] sm:$0xff]  ;;  %v665_v5 = vld [vmem:[#allocation2 + $0x458] sm:$0xff]  ;;  %v660_v7 = vld [vmem:[#allocation2 + $0x430] sm:$0xff]  ;;  %v2526_v8 = vpack.c.bf16 %v652_v1, %v646_v63 }
  0xaa   : > { %2513 = vmatprep.subr.bf16.mxu0 %v2512_v28  ;;  %v659_v4 = vld [vmem:[#allocation2 + $0x428] sm:$0xff]  ;;  %v2592_v9 = vpack.c.bf16 %v667_v3, %v661_v2  ;;  %v666_v10 = vld [vmem:[#allocation2 + $0x460] sm:$0xff]  ;;  %v664_v12 = vld [vmem:[#allocation2 + $0x450] sm:$0xff]  ;;  %v3212_v2 = vmov 0.0  }
  0xab   : > { %2579 = vmatpush1.bf16.msra.mxu1 %v2578_v34  ;;  %v658_v11 = vld [vmem:[#allocation2 + $0x420] sm:$0xff]  ;;  %v2528_v13 = vpack.c.bf16 %v665_v5, %v659_v4  ;;  %v673_v14 = vld [vmem:[#allocation2 + $0x498] sm:$0xff]  ;;  %v679_v15 = vld [vmem:[#allocation2 + $0x4c8] sm:$0xff]  ;;  %v2594_v19 = vpack.c.bf16 %v666_v10, %v660_v7 }
  0xac   : > { %2581 = vmatprep.subr.bf16.mxu1 %v2580_v36  ;;  %v3480_v16 = vld [vmem:[%s3477_s2 + $0x8] sm:$0xff]  ;;  %v677_v18 = vld [vmem:[#allocation2 + $0x4b8] sm:$0xff]  ;;  %v2530_v20 = vpack.c.bf16 %v664_v12, %v658_v11  ;;  %v2596_v21 = vpack.c.bf16 %v679_v15, %v673_v14  ;;  %v672_v22 = vld [vmem:[#allocation2 + $0x490] sm:$0xff] }
  0xad   : > { %2515 = vmatpush1.bf16.msra.mxu0 %v2514_v35  ;;  %v671_v17 = vld [vmem:[#allocation2 + $0x488] sm:$0xff]  ;;  %853 = vmatprep.mubr.f32.mxu1 %v3480_v16  ;;  %v678_v23 = vld [vmem:[#allocation2 + $0x4c0] sm:$0xff]  ;;  %v676_v26 = vld [vmem:[#allocation2 + $0x4b0] sm:$0xff] }
  0xae   : > { %2517 = vmatprep.subr.bf16.mxu0 %v2516_v40  ;;  %782 = vmatprep.mubr.f32.mxu0 %v3480_v16  ;;  %v670_v24 = vld [vmem:[#allocation2 + $0x480] sm:$0xff]  ;;  %v2532_v25 = vpack.c.bf16 %v677_v18, %v671_v17  ;;  %v685_v27 = vld [vmem:[#allocation2 + $0x4f8] sm:$0xff]  ;;  %v691_v28 = vld [vmem:[#allocation2 + $0x528] sm:$0xff]  ;;  %v2598_v31 = vpack.c.bf16 %v678_v23, %v672_v22 }
  0xaf   : > { %2583 = vmatpush1.bf16.msra.mxu1 %v2582_v46  ;;  %v683_v29 = vld [vmem:[#allocation2 + $0x4e8] sm:$0xff]  ;;  %v689_v30 = vld [vmem:[#allocation2 + $0x518] sm:$0xff]  ;;  %v2534_v32 = vpack.c.bf16 %v676_v26, %v670_v24  ;;  %v2600_v33 = vpack.c.bf16 %v691_v28, %v685_v27  ;;  %v684_v34 = vld [vmem:[#allocation2 + $0x4f0] sm:$0xff] }
  0xb0   : > { %2585 = vmatprep.subr.bf16.mxu1 %v2584_v48  ;;  %v690_v35 = vld [vmem:[#allocation2 + $0x520] sm:$0xff]  ;;  %v2536_v37 = vpack.c.bf16 %v689_v30, %v683_v29  ;;  %v688_v38 = vld [vmem:[#allocation2 + $0x510] sm:$0xff]  ;;  %v697_v39 = vld [vmem:[#allocation2 + $0x558] sm:$0xff] }
  0xb1   : > { %2519 = vmatpush1.bf16.msra.mxu0 %v2518_v47  ;;  %v682_v36 = vld [vmem:[#allocation2 + $0x4e0] sm:$0xff]  ;;  %v703_v40 = vld [vmem:[#allocation2 + $0x588] sm:$0xff]  ;;  %v701_v42 = vld [vmem:[#allocation2 + $0x578] sm:$0xff]  ;;  %v2602_v43 = vpack.c.bf16 %v690_v35, %v684_v34 }
  0xb2   : > { %2521 = vmatprep.subr.bf16.mxu0 %v2520_v52  ;;  %v695_v41 = vld [vmem:[#allocation2 + $0x548] sm:$0xff]  ;;  %v2538_v44 = vpack.c.bf16 %v688_v38, %v682_v36  ;;  %v2604_v45 = vpack.c.bf16 %v703_v40, %v697_v39  ;;  %v696_v46 = vld [vmem:[#allocation2 + $0x550] sm:$0xff]  ;;  %v702_v47 = vld [vmem:[#allocation2 + $0x580] sm:$0xff] }
  0xb3   : > { %2587 = vmatpush1.bf16.msra.mxu1 %v2586_v58  ;;  %v694_v48 = vld [vmem:[#allocation2 + $0x540] sm:$0xff]  ;;  %v2540_v49 = vpack.c.bf16 %v701_v42, %v695_v41  ;;  %v700_v50 = vld [vmem:[#allocation2 + $0x570] sm:$0xff]  ;;  %v709_v51 = vld [vmem:[#allocation2 + $0x5b8] sm:$0xff]  ;;  %v2606_v55 = vpack.c.bf16 %v702_v47, %v696_v46 }
  0xb4   : > { %2589 = vmatprep.subr.bf16.mxu1 %v2588_v60  ;;  %v715_v52 = vld [vmem:[#allocation2 + $0x5e8] sm:$0xff]  ;;  %v713_v54 = vld [vmem:[#allocation2 + $0x5d8] sm:$0xff]  ;;  %v2542_v56 = vpack.c.bf16 %v700_v50, %v694_v48  ;;  %v708_v58 = vld [vmem:[#allocation2 + $0x5b0] sm:$0xff] }
  0xb5   : > { %2523 = vmatpush1.bf16.msra.mxu0 %v2522_v59  ;;  %v707_v53 = vld [vmem:[#allocation2 + $0x5a8] sm:$0xff]  ;;  %v2608_v57 = vpack.c.bf16 %v715_v52, %v709_v51  ;;  %v714_v59 = vld [vmem:[#allocation2 + $0x5e0] sm:$0xff]  ;;  %v712_v62 = vld [vmem:[#allocation2 + $0x5d0] sm:$0xff] }
  0xb6   : > { %2525 = vmatprep.subr.bf16.mxu0 %v2524_v0  ;;  %v2544_v60 = vpack.c.bf16 %v713_v54, %v707_v53  ;;  %v706_v61 = vld [vmem:[#allocation2 + $0x5a0] sm:$0xff]  ;;  %v2610_v63 = vpack.c.bf16 %v714_v59, %v708_v58  ;;  %v531_v7 = vld [vmem:[#allocation2 + $0x28] sm:$0xff]  ;;  %v536_v11 = vld [vmem:[#allocation2 + $0x50] sm:$0xff] }
  0xb7   : > { %2591 = vmatpush1.bf16.msra.mxu1 %v2590_v6  ;;  %v2546_v0 = vpack.c.bf16 %v712_v62, %v706_v61  ;;  %v3485_v1 = vld [vmem:[%s3477_s2] sm:$0xff]  ;;  %v543_v12 = vld [vmem:[#allocation2 + $0x88] sm:$0xff]  ;;  %v548_v18 = vld [vmem:[#allocation2 + $0xb0] sm:$0xff]  ;;  %s2389_s2 = sshll.u32 %s3312_s17, 4  ;;  %s3215_s17 = smov [#allocation10]  }
  0xb8   : > { %2593 = vmatprep.subr.bf16.mxu1 %v2592_v9  ;;  %v530_v9 = vld [vmem:[#allocation2 + $0x20] sm:$0xff]  ;;  %v560_v24 = vld [vmem:[#allocation2 + $0x110] sm:$0xff]  ;;  %v573_v26 = vld [vmem:[#allocation2 + $0x178] sm:$0xff]  ;;  %s3730_s22 = scalar_lea.hbm %s3830_s21, %s2389_s2  ;;  %s3132_s20 = sshll.u32 %s3215_s17, 4  ;;  %s3133_s20 = int_to_ptr.vmem [resolvable:$false] %s3132_s20 }
  0xb9   : > { %2527 = vmatpush1.bf16.msra.mxu0 %v2526_v8  ;;  %v537_v8 = vld [vmem:[#allocation2 + $0x58] sm:$0xff]  ;;  %v2614_v14 = vpack.c.bf16 %v536_v11, %v530_v9  ;;  %v542_v17 = vld [vmem:[#allocation2 + $0x80] sm:$0xff]  ;;  %v572_v30 = vld [vmem:[#allocation2 + $0x170] sm:$0xff]  ;;  %s3134_s15 = scalar_lea.vmem %s3133_s20, 32 }
  0xba   : > { %2529 = vmatprep.subr.bf16.mxu0 %v2528_v13  ;;  %v2612_v10 = vpack.c.bf16 %v537_v8, %v531_v7  ;;  %v549_v13 = vld [vmem:[#allocation2 + $0xb8] sm:$0xff]  ;;  %v554_v23 = vld [vmem:[#allocation2 + $0xe0] sm:$0xff]  ;;  %v584_v36 = vld [vmem:[#allocation2 + $0x1d0] sm:$0xff] }
  0xbb   : > { %2595 = vmatpush1.bf16.msra.mxu1 %v2594_v19  ;;  %v2616_v15 = vpack.c.bf16 %v549_v13, %v543_v12  ;;  %v555_v19 = vld [vmem:[#allocation2 + $0xe8] sm:$0xff]  ;;  %v2622_v27 = vpack.c.bf16 %v560_v24, %v554_v23  ;;  %v566_v29 = vld [vmem:[#allocation2 + $0x140] sm:$0xff]  ;;  %v597_v38 = vld [vmem:[#allocation2 + $0x238] sm:$0xff] }
  0xbc   : > { %2597 = vmatprep.subr.bf16.mxu1 %v2596_v21  ;;  %v2618_v21 = vpack.c.bf16 %v548_v18, %v542_v17  ;;  %v578_v35 = vld [vmem:[#allocation2 + $0x1a0] sm:$0xff]  ;;  %v596_v42 = vld [vmem:[#allocation2 + $0x230] sm:$0xff]  ;;  %v621_v50 = vld [vmem:[#allocation2 + $0x2f8] sm:$0xff] }
  0xbd   : > { %2531 = vmatpush1.bf16.msra.mxu0 %v2530_v20  ;;  %v561_v20 = vld [vmem:[#allocation2 + $0x118] sm:$0xff]  ;;  %v2630_v39 = vpack.c.bf16 %v584_v36, %v578_v35  ;;  %v590_v41 = vld [vmem:[#allocation2 + $0x200] sm:$0xff]  ;;  %v608_v48 = vld [vmem:[#allocation2 + $0x290] sm:$0xff] }
  0xbe   : > { %2533 = vmatprep.subr.bf16.mxu0 %v2532_v25  ;;  %v2620_v22 = vpack.c.bf16 %v561_v20, %v555_v19  ;;  %v567_v25 = vld [vmem:[#allocation2 + $0x148] sm:$0xff]  ;;  %v602_v47 = vld [vmem:[#allocation2 + $0x260] sm:$0xff]  ;;  %v620_v54 = vld [vmem:[#allocation2 + $0x2f0] sm:$0xff] }
  0xbf   : > { %2599 = vmatpush1.bf16.msra.mxu1 %v2598_v31  ;;  %v2624_v28 = vpack.c.bf16 %v573_v26, %v567_v25  ;;  %v579_v31 = vld [vmem:[#allocation2 + $0x1a8] sm:$0xff]  ;;  %v2638_v51 = vpack.c.bf16 %v608_v48, %v602_v47  ;;  %v614_v53 = vld [vmem:[#allocation2 + $0x2c0] sm:$0xff]  ;;  %v645_v62 = vld [vmem:[#allocation2 + $0x3b8] sm:$0xff] }
  0xc0   : > { %2601 = vmatprep.subr.bf16.mxu1 %v2600_v33  ;;  %v2626_v33 = vpack.c.bf16 %v572_v30, %v566_v29  ;;  %v626_v59 = vld [vmem:[#allocation2 + $0x320] sm:$0xff]  ;;  %v639_v61 = vld [vmem:[#allocation2 + $0x388] sm:$0xff]  ;;  %v657_v8 = vld [vmem:[#allocation2 + $0x418] sm:$0xff] }
  0xc1   : > { %2535 = vmatpush1.bf16.msra.mxu0 %v2534_v32  ;;  %v585_v32 = vld [vmem:[#allocation2 + $0x1d8] sm:$0xff]  ;;  %v651_v7 = vld [vmem:[#allocation2 + $0x3e8] sm:$0xff]  ;;  %v650_v11 = vld [vmem:[#allocation2 + $0x3e0] sm:$0xff] }
  0xc2   : > { %2537 = vmatprep.subr.bf16.mxu0 %v2536_v37  ;;  %v2628_v34 = vpack.c.bf16 %v585_v32, %v579_v31  ;;  %v591_v37 = vld [vmem:[#allocation2 + $0x208] sm:$0xff]  ;;  %v656_v12 = vld [vmem:[#allocation2 + $0x410] sm:$0xff]  ;;  %v662_v18 = vld [vmem:[#allocation2 + $0x440] sm:$0xff] }
  0xc3   : > { %2603 = vmatpush1.bf16.msra.mxu1 %v2602_v43  ;;  %v2632_v40 = vpack.c.bf16 %v597_v38, %v591_v37  ;;  %v603_v43 = vld [vmem:[#allocation2 + $0x268] sm:$0xff]  ;;  %v668_v19 = vld [vmem:[#allocation2 + $0x470] sm:$0xff]  ;;  %v674_v24 = vld [vmem:[#allocation2 + $0x4a0] sm:$0xff] }
  0xc4   : > { %2605 = vmatprep.subr.bf16.mxu1 %v2604_v45  ;;  %v2634_v45 = vpack.c.bf16 %v596_v42, %v590_v41  ;;  %v663_v13 = vld [vmem:[#allocation2 + $0x448] sm:$0xff]  ;;  %v680_v25 = vld [vmem:[#allocation2 + $0x4d0] sm:$0xff]  ;;  %v686_v30 = vld [vmem:[#allocation2 + $0x500] sm:$0xff] }
  0xc5   : > { %2539 = vmatpush1.bf16.msra.mxu0 %v2538_v44  ;;  %v609_v44 = vld [vmem:[#allocation2 + $0x298] sm:$0xff]  ;;  %v675_v20 = vld [vmem:[#allocation2 + $0x4a8] sm:$0xff]  ;;  %v692_v31 = vld [vmem:[#allocation2 + $0x530] sm:$0xff] }
  0xc6   : > { %2541 = vmatprep.subr.bf16.mxu0 %v2540_v49  ;;  %v2636_v46 = vpack.c.bf16 %v609_v44, %v603_v43  ;;  %v615_v49 = vld [vmem:[#allocation2 + $0x2c8] sm:$0xff]  ;;  %v698_v36 = vld [vmem:[#allocation2 + $0x560] sm:$0xff]  ;;  %v704_v37 = vld [vmem:[#allocation2 + $0x590] sm:$0xff] }
  0xc7   : > { %2607 = vmatpush1.bf16.msra.mxu1 %v2606_v55  ;;  %v2640_v52 = vpack.c.bf16 %v621_v50, %v615_v49  ;;  %v627_v55 = vld [vmem:[#allocation2 + $0x328] sm:$0xff]  ;;  %v710_v42 = vld [vmem:[#allocation2 + $0x5c0] sm:$0xff]  ;;  %v716_v43 = vld [vmem:[#allocation2 + $0x5f0] sm:$0xff] }
  0xc8   : > { %2609 = vmatprep.subr.bf16.mxu1 %v2608_v57  ;;  %v2642_v57 = vpack.c.bf16 %v620_v54, %v614_v53  ;;  %v687_v26 = vld [vmem:[#allocation2 + $0x508] sm:$0xff]  ;;  %v2674_v44 = vpack.c.bf16 %v716_v43, %v710_v42 }
  0xc9   : > { %2543 = vmatpush1.bf16.msra.mxu0 %v2542_v56  ;;  %v633_v56 = vld [vmem:[#allocation2 + $0x358] sm:$0xff]  ;;  %v699_v32 = vld [vmem:[#allocation2 + $0x568] sm:$0xff] }
  0xca   : > { %2545 = vmatprep.subr.bf16.mxu0 %v2544_v60  ;;  %v2644_v58 = vpack.c.bf16 %v633_v56, %v627_v55  ;;  %v632_v60 = vld [vmem:[#allocation2 + $0x350] sm:$0xff]  ;;  %v711_v38 = vld [vmem:[#allocation2 + $0x5c8] sm:$0xff] }
  0xcb   : > { %2611 = vmatpush1.bf16.msra.mxu1 %v2610_v63  ;;  %v2646_v63 = vpack.c.bf16 %v632_v60, %v626_v59 }
  0xcc   : > { %2444 = vmatprep.subr.mxu1 %v3212_v2 }
  0xcd   : > { %2547 = vmatpush1.bf16.msra.mxu0 %v2546_v0  ;;  %v2648_v0 = vpack.c.bf16 %v645_v62, %v639_v61 }
  0xce   : > { %854 = vmatmul.mubr.f32.vlgmr.msra.gmra.mrb[0].mxu1 %v3485_v1  ;;  %2613 = vmatprep.subr.bf16.mxu0 %v2612_v10  ;;  %v2652_v10 = vpack.c.bf16 %v657_v8, %v651_v7 }
  0xcf   : > { %2446 = vmatprep.mubr.msk.f32.mxu1 %vm3213_vm0, %v3212_v2 }
  0xd0   : > { %783 = vmatmul.mubr.f32.vlgmr.msra.gmra.mrb[0].mxu0 %v3485_v1 }
  0xd1   : > { %924 = vmatprep.mubr.f32.mxu0 %v3480_v16  ;;  %2615 = vmatpush1.bf16.msra.mxu0 %v2614_v14  ;;  %v669_v14 = vld [vmem:[#allocation2 + $0x478] sm:$0xff] }
  0xd2   : > { %2617 = vmatprep.subr.bf16.mxu0 %v2616_v15  ;;  %v2654_v15 = vpack.c.bf16 %v656_v12, %v650_v11  ;;  %v2656_v17 = vpack.c.bf16 %v669_v14, %v663_v13 }
  0xd5   : > { %2619 = vmatpush1.bf16.msra.mxu0 %v2618_v21  ;;  %v681_v21 = vld [vmem:[#allocation2 + $0x4d8] sm:$0xff] }
  0xd6   : > { %2621 = vmatprep.subr.bf16.mxu0 %v2620_v22  ;;  %v2658_v22 = vpack.c.bf16 %v668_v19, %v662_v18  ;;  %v2660_v23 = vpack.c.bf16 %v681_v21, %v675_v20 }
  0xd9   : > { %2623 = vmatpush1.bf16.msra.mxu0 %v2622_v27  ;;  %v693_v27 = vld [vmem:[#allocation2 + $0x538] sm:$0xff] }
  0xda   : > { %2625 = vmatprep.subr.bf16.mxu0 %v2624_v28  ;;  %v2662_v28 = vpack.c.bf16 %v680_v25, %v674_v24  ;;  %v2664_v29 = vpack.c.bf16 %v693_v27, %v687_v26 }
  0xdd   : > { %2627 = vmatpush1.bf16.msra.mxu0 %v2626_v33  ;;  %v705_v33 = vld [vmem:[#allocation2 + $0x598] sm:$0xff] }
  0xde   : > { %2629 = vmatprep.subr.bf16.mxu0 %v2628_v34  ;;  %v2666_v34 = vpack.c.bf16 %v692_v31, %v686_v30  ;;  %v2668_v35 = vpack.c.bf16 %v705_v33, %v699_v32 }
  0xe1   : > { %2631 = vmatpush1.bf16.msra.mxu0 %v2630_v39  ;;  %v717_v39 = vld [vmem:[#allocation2 + $0x5f8] sm:$0xff] }
  0xe2   : > { %2633 = vmatprep.subr.bf16.mxu0 %v2632_v40  ;;  %v2670_v40 = vpack.c.bf16 %v704_v37, %v698_v36  ;;  %v2672_v41 = vpack.c.bf16 %v717_v39, %v711_v38 }
  0xe5   : > { %2635 = vmatpush1.bf16.msra.mxu0 %v2634_v45 }
  0xe6   : > { %2637 = vmatprep.subr.bf16.mxu0 %v2636_v46 }
  0xe9   : > { %2639 = vmatpush1.bf16.msra.mxu0 %v2638_v51 }
  0xea   : > { %2641 = vmatprep.subr.bf16.mxu0 %v2640_v52 }
  0xed   : > { %2643 = vmatpush1.bf16.msra.mxu0 %v2642_v57 }
  0xee   : > { %2645 = vmatprep.subr.bf16.mxu0 %v2644_v58 }
  0xf1   : > { %2647 = vmatpush1.bf16.msra.mxu0 %v2646_v63 }
  0xf2   : > { %2649 = vmatprep.subr.bf16.mxu0 %v2648_v0 }
 0x1a1   : > { %v855_v3 = vpop.f32.mrb[0].mxu1 }
 0x1a2   : > { %1096 = vrot.lane.b32.xlu1 %v855_v3, %s3214_s24  ;;  %v3494_v4 = vpop.f32.mrb[1].mxu1  ;;  %2445 = vmatpush3.xpose.msk.msra.mxu1 %vm931_vm1, %v855_v3  ;;  %v638_v3 = vld [vmem:[#allocation2 + $0x380] sm:$0xff] }
 0x1a3   : > { %v784_v5 = vpop.f32.mrb[0].mxu0  ;;  %2449 = vmatprep.subr.mxu1 %v3212_v2 }
 0x1a4   : > { %v3497_v6 = vpop.f32.mrb[1].mxu0 }
 0x1a5   : > { %2447 = vmatmul.mubr.msk.f32.vlgmr.msra.gmra.mrb[2].mxu1 %vm931_vm1, %v784_v5 }
 0x1a6   : > { %1094 = vrot.lane.b32.xlu1 %v784_v5, %s3214_s24  ;;  %2451 = vmatprep.mubr.msk.f32.mxu1 %vm3213_vm0, %v3212_v2  ;;  %v644_v5 = vld [vmem:[#allocation2 + $0x3b0] sm:$0xff] }
 0x1a7   : > { %v2650_v9 = vpack.c.bf16 %v644_v5, %v638_v3 }
 0x1a9   : > { %2651 = vmatpush1.bf16.msra.mxu0 %v2650_v9 }
 0x1aa   : > { %2653 = vmatprep.subr.bf16.mxu0 %v2652_v10 }
 0x1ad   : > { %2655 = vmatpush1.bf16.msra.mxu0 %v2654_v15 }
 0x1ae   : > { %2657 = vmatprep.subr.bf16.mxu0 %v2656_v17 }
 0x1b1   : > { %2659 = vmatpush1.bf16.msra.mxu0 %v2658_v22 }
 0x1b2   : > { %2661 = vmatprep.subr.bf16.mxu0 %v2660_v23 }
 0x1b5   : > { %2663 = vmatpush1.bf16.msra.mxu0 %v2662_v28 }
 0x1b6   : > { %2665 = vmatprep.subr.bf16.mxu0 %v2664_v29 }
 0x1b9   : > { %2667 = vmatpush1.bf16.msra.mxu0 %v2666_v34 }
 0x1ba   : > { %2669 = vmatprep.subr.bf16.mxu0 %v2668_v35 }
 0x1bd   : > { %2671 = vmatpush1.bf16.msra.mxu0 %v2670_v40 }
 0x1be   : > { %2673 = vmatprep.subr.bf16.mxu0 %v2672_v41 }
 0x1c1   : > { %2675 = vmatpush1.bf16.msra.mxu0 %v2674_v44 }
 0x1c4   : > { %925 = vmatmul.mubr.f32.vlgmr.msra.gmra.mrb[2].mxu0 %v3485_v1 }
 0x214   : > { %v1097_v58 = vpop.permute.xlu1 %1096 }
 0x218   : > { %v1095_v60 = vpop.permute.xlu1 %1094 }
 0x278   : > { %v1004_v45 = vpop.f32.mrb[2].mxu1 }
 0x279   : > { %v1008_v46 = vmul.f32 0.125, %v1004_v45  ;;  %v2448_v47 = vpop.f32.mrb[3].mxu1  ;;  %v1600_v45 = vld [vmem:[#allocation5 + $0x8] sm:$0xff] }
 0x27a   : > { %v1599_v47 = vld [vmem:[#allocation5] sm:$0xff] }
 0x27b   : > { %v1010_v48 = vsel %vm1009_vm2, %v1008_v46, -inf }
 0x27c   : > { %1011 = vmax.xlane.f32.xlu0 %v1010_v48 }
 0x297   : > { %v926_v54 = vpop.f32.mrb[2].mxu0 }
 0x298   : > { %v3507_v55 = vpop.f32.mrb[3].mxu0  ;;  %2450 = vmatpush3.msra.mxu1 %v926_v54 }
 0x299   : > { %2454 = vmatprep.subr.mxu1 %v3212_v2 }
 0x309   : > { %v1012_v49 = vpop.xlane.xlu0 %1011 }
 0x30a   : > { %v1013_v50 = vsub.f32 %v1008_v46, %v1012_v49  ;;  %v1602_v46 = vld [vmem:[#allocation5 + $0x18] sm:$0xff]  ;;  %v1601_v49 = vld [vmem:[#allocation5 + $0x10] sm:$0xff] }
 0x30b   : > { %v2676_v48 = vpack.c.bf16 %v1602_v46, %v1600_v45  ;;  %v1640_v45 = vld [vmem:[#allocation5 + $0x148] sm:$0xff]  ;;  %v1642_v46 = vld [vmem:[#allocation5 + $0x158] sm:$0xff] }
 0x30c   : > { %v1014_v51 = vmul.f32 1.442695, %v1013_v50  ;;  %v1604_v50 = vld [vmem:[#allocation5 + $0x28] sm:$0xff] }
 0x30e   : > { %2992 = vpow2.f32 %v1014_v51  ;;  %v1606_v51 = vld [vmem:[#allocation5 + $0x38] sm:$0xff] }
 0x318   : > { %v2993_v52 = vpop.eup %2992 }
 0x319   : > { %v1016_v53 = vsel %vm1009_vm2, %v2993_v52, 0.0 }
 0x31a   : > { %1017 = vadd.xlane.f32.xlu0 %v1016_v53  ;;  %v2680_v53 = vpack.c.bf16 %v1606_v51, %v1604_v50  ;;  %v1641_v50 = vld [vmem:[#allocation5 + $0x150] sm:$0xff]  ;;  %v1644_v51 = vld [vmem:[#allocation5 + $0x168] sm:$0xff] }
 0x3a7   : > { %v1018_v56 = vpop.xlane.xlu0 %1017 }
 0x3a8   : > { %2994 = vrcp.f32 %v1018_v56  ;;  %v1608_v56 = vld [vmem:[#allocation5 + $0x48] sm:$0xff] }
 0x3b2   : > { %v2995_v57 = vpop.eup %2994 }
 0x3b3   : > { %v1020_v59 = vmul.f32 %v2995_v57, %v2993_v52  ;;  %v2678_v52 = vpack.c.bf16 %v1601_v49, %v1599_v47  ;;  %v1610_v57 = vld [vmem:[#allocation5 + $0x58] sm:$0xff]  ;;  %v1639_v49 = vld [vmem:[#allocation5 + $0x140] sm:$0xff] }
 0x3b5   : > { %2452 = vmatmul.mubr.msk.f32.vlgmr.msra.gmra.mrb[4].mxu1 %vm1009_vm2, %v1020_v59  ;;  %v2684_v59 = vpack.c.bf16 %v1610_v57, %v1608_v56  ;;  %v1645_v56 = vld [vmem:[#allocation5 + $0x170] sm:$0xff]  ;;  %v1648_v57 = vld [vmem:[#allocation5 + $0x188] sm:$0xff] }
 0x3b6   : > { %2455 = vmatpush3.xpose.msk.msra.mxu1 %vm931_vm1, %v1097_v58  ;;  %2456 = vmatprep.mubr.msk.f32.mxu1 %vm3213_vm0, %v3212_v2 }
 0x3b7   : > { %2459 = vmatprep.subr.mxu1 %v3212_v2 }
 0x3b9   : > { %2457 = vmatmul.mubr.msk.f32.vlgmr.msra.gmra.mrb[6].mxu1 %vm931_vm1, %v1095_v60  ;;  %v1607_v60 = vld [vmem:[#allocation5 + $0x40] sm:$0xff] }
 0x3ba   : > { %2461 = vmatprep.mubr.msk.f32.mxu1 %vm3213_vm0, %v3212_v2 }
 0x488   : > { %v3518_v61 = vpop.f32.mrb[4].mxu1 }
 0x489   : > { %v2453_v62 = vpop.f32.mrb[5].mxu1 }
 0x48a   : > { %v1609_v62 = vld [vmem:[#allocation5 + $0x50] sm:$0xff] }
 0x48c   : > { %v1168_v63 = vpop.f32.mrb[6].mxu1 }
 0x48d   : > { %v1172_v0 = vmul.f32 0.125, %v1168_v63  ;;  %v2458_v3 = vpop.f32.mrb[7].mxu1  ;;  %v1612_v63 = vld [vmem:[#allocation5 + $0x68] sm:$0xff] }
 0x48e   : > { %v2686_v3 = vpack.c.bf16 %v1609_v62, %v1607_v60  ;;  %v1647_v62 = vld [vmem:[#allocation5 + $0x180] sm:$0xff] }
 0x48f   : > { %v1173_v5 = vsel %vm1009_vm2, %v1172_v0, -inf }
 0x490   : > { %1174 = vmax.xlane.f32.xlu0 %v1173_v5 }
 0x4a6   : > { %1185 = vrot.lane.b32.xlu0 %v926_v54, %s3214_s24  ;;  %v1603_v54 = vld [vmem:[#allocation5 + $0x20] sm:$0xff] }
 0x51d   : > { %v1175_v7 = vpop.xlane.xlu0 %1174 }
 0x51e   : > { %v1176_v8 = vsub.f32 %v1172_v0, %v1175_v7  ;;  %v1614_v0 = vld [vmem:[#allocation5 + $0x78] sm:$0xff]  ;;  %v1611_v7 = vld [vmem:[#allocation5 + $0x60] sm:$0xff] }
 0x51f   : > { %v2688_v5 = vpack.c.bf16 %v1614_v0, %v1612_v63  ;;  %v1649_v63 = vld [vmem:[#allocation5 + $0x190] sm:$0xff]  ;;  %v1652_v0 = vld [vmem:[#allocation5 + $0x1a8] sm:$0xff] }
 0x520   : > { %v1177_v9 = vmul.f32 1.442695, %v1176_v8  ;;  %v1613_v8 = vld [vmem:[#allocation5 + $0x70] sm:$0xff] }
 0x521   : > { %v1186_v10 = vpop.permute.xlu0 %1185 }
 0x522   : > { %2996 = vpow2.f32 %v1177_v9  ;;  %2460 = vmatpush3.msra.mxu1 %v1186_v10  ;;  %v1616_v9 = vld [vmem:[#allocation5 + $0x88] sm:$0xff]  ;;  %v1618_v10 = vld [vmem:[#allocation5 + $0x98] sm:$0xff] }
 0x523   : > { %2464 = vmatprep.subr.mxu1 %v3212_v2 }
 0x52c   : > { %v2997_v11 = vpop.eup %2996 }
 0x52d   : > { %v1179_v12 = vsel %vm1009_vm2, %v2997_v11, 0.0 }
 0x52e   : > { %1180 = vadd.xlane.f32.xlu1 %v1179_v12  ;;  %v2692_v12 = vpack.c.bf16 %v1618_v10, %v1616_v9  ;;  %v1653_v9 = vld [vmem:[#allocation5 + $0x1b0] sm:$0xff]  ;;  %v1656_v10 = vld [vmem:[#allocation5 + $0x1c8] sm:$0xff] }
 0x5bb   : > { %v1181_v13 = vpop.xlane.xlu1 %1180 }
 0x5bc   : > { %2998 = vrcp.f32 %v1181_v13  ;;  %v1615_v13 = vld [vmem:[#allocation5 + $0x80] sm:$0xff] }
 0x5c6   : > { %v2999_v14 = vpop.eup %2998 }
 0x5c7   : > { %v1183_v15 = vmul.f32 %v2999_v14, %v2997_v11  ;;  %v2690_v11 = vpack.c.bf16 %v1613_v8, %v1611_v7  ;;  %v1617_v14 = vld [vmem:[#allocation5 + $0x90] sm:$0xff]  ;;  %v1651_v8 = vld [vmem:[#allocation5 + $0x1a0] sm:$0xff] }
 0x5c9   : > { %2462 = vmatmul.mubr.msk.f32.vlgmr.msra.gmra.mrb[8].mxu1 %vm1009_vm2, %v1183_v15  ;;  %v1620_v15 = vld [vmem:[#allocation5 + $0xa8] sm:$0xff] }
 0x5ca   : > { %2465 = vmatpush3.xpose.msk.msra.mxu1 %vm931_vm1, %v3494_v4  ;;  %2466 = vmatprep.mubr.msk.f32.mxu1 %vm3213_vm0, %v3212_v2 }
 0x5cb   : > { %2469 = vmatprep.subr.mxu1 %v3212_v2 }
 0x5cd   : > { %2467 = vmatmul.mubr.msk.f32.vlgmr.msra.gmra.mrb[10].mxu1 %vm931_vm1, %v3497_v6 }
 0x5ce   : > { %2470 = vmatpush3.msra.mxu1 %v3507_v55  ;;  %2471 = vmatprep.mubr.msk.f32.mxu1 %vm3213_vm0, %v3212_v2 }
 0x5cf   : > { %2474 = vmatprep.subr.mxu1 %v3212_v2 }
 0x69c   : > { %v3536_v17 = vpop.f32.mrb[8].mxu1 }
 0x69d   : > { %v2463_v18 = vpop.f32.mrb[9].mxu1 }
 0x69e   : > { %v1622_v18 = vld [vmem:[#allocation5 + $0xb8] sm:$0xff] }
 0x6a0   : > { %v1333_v19 = vpop.f32.mrb[10].mxu1 }
 0x6a1   : > { %v1337_v20 = vmul.f32 0.125, %v1333_v19  ;;  %v2468_v21 = vpop.f32.mrb[11].mxu1  ;;  %v2694_v19 = vpack.c.bf16 %v1617_v14, %v1615_v13  ;;  %v1655_v14 = vld [vmem:[#allocation5 + $0x1c0] sm:$0xff] }
 0x6a2   : > { %v1619_v21 = vld [vmem:[#allocation5 + $0xa0] sm:$0xff] }
 0x6a3   : > { %v1338_v22 = vsel %vm1009_vm2, %v1337_v20, -inf }
 0x6a4   : > { %1339 = vmax.xlane.f32.xlu0 %v1338_v22  ;;  %v1621_v22 = vld [vmem:[#allocation5 + $0xb0] sm:$0xff] }
 0x6ba   : > { %1422 = vrot.lane.b32.xlu0 %v3497_v6, %s3214_s24 }
 0x731   : > { %v1340_v23 = vpop.xlane.xlu0 %1339 }
 0x732   : > { %v1341_v24 = vsub.f32 %v1337_v20, %v1340_v23  ;;  %v2696_v20 = vpack.c.bf16 %v1622_v18, %v1620_v15  ;;  %v1624_v23 = vld [vmem:[#allocation5 + $0xc8] sm:$0xff]  ;;  %v1657_v15 = vld [vmem:[#allocation5 + $0x1d0] sm:$0xff] }
 0x733   : > { %v2734_v18 = vpack.c.bf16 %v1657_v15, %v1655_v14  ;;  %v1820_v14 = vld [vmem:[#allocation7 + $0xa0] sm:$0xff]  ;;  %v1822_v15 = vld [vmem:[#allocation7 + $0xb0] sm:$0xff] }
 0x734   : > { %v1342_v25 = vmul.f32 1.442695, %v1341_v24  ;;  %v1626_v24 = vld [vmem:[#allocation5 + $0xd8] sm:$0xff] }
 0x735   : > { %v1423_v6 = vpop.permute.xlu0 %1422 }
 0x736   : > { %3000 = vpow2.f32 %v1342_v25  ;;  %v2698_v25 = vpack.c.bf16 %v1621_v22, %v1619_v21  ;;  %v1659_v22 = vld [vmem:[#allocation5 + $0x1e0] sm:$0xff] }
 0x740   : > { %v3001_v26 = vpop.eup %3000 }
 0x741   : > { %v1344_v27 = vsel %vm1009_vm2, %v3001_v26, 0.0 }
 0x742   : > { %1345 = vadd.xlane.f32.xlu1 %v1344_v27  ;;  %v1623_v27 = vld [vmem:[#allocation5 + $0xc0] sm:$0xff] }
 0x753   : > { %1424 = vrot.lane.b32.xlu1 %v3494_v4, %s3214_s24 }
 0x7cf   : > { %v1346_v28 = vpop.xlane.xlu1 %1345 }
 0x7d0   : > { %3002 = vrcp.f32 %v1346_v28  ;;  %v1625_v28 = vld [vmem:[#allocation5 + $0xd0] sm:$0xff] }
 0x7d3   : > { %v1425_v31 = vpop.permute.xlu1 %1424 }
 0x7da   : > { %v3003_v29 = vpop.eup %3002 }
 0x7db   : > { %v1348_v30 = vmul.f32 %v3003_v29, %v3001_v26  ;;  %v2700_v26 = vpack.c.bf16 %v1626_v24, %v1624_v23  ;;  %v1628_v29 = vld [vmem:[#allocation5 + $0xe8] sm:$0xff]  ;;  %v1661_v23 = vld [vmem:[#allocation5 + $0x1f0] sm:$0xff] }
 0x7dc   : > { %v2738_v24 = vpack.c.bf16 %v1661_v23, %v1659_v22  ;;  %v1824_v22 = vld [vmem:[#allocation7 + $0xc0] sm:$0xff]  ;;  %v1826_v23 = vld [vmem:[#allocation7 + $0xd0] sm:$0xff] }
 0x7dd   : > { %2472 = vmatmul.mubr.msk.f32.vlgmr.msra.gmra.mrb[12].mxu1 %vm1009_vm2, %v1348_v30  ;;  %v1630_v30 = vld [vmem:[#allocation5 + $0xf8] sm:$0xff] }
 0x7de   : > { %2475 = vmatpush3.xpose.msk.msra.mxu1 %vm931_vm1, %v1425_v31  ;;  %2476 = vmatprep.mubr.msk.f32.mxu1 %vm3213_vm0, %v3212_v2  ;;  %v2702_v31 = vpack.c.bf16 %v1625_v28, %v1623_v27 }
 0x7df   : > { %2479 = vmatprep.subr.mxu1 %v3212_v2 }
 0x7e1   : > { %2477 = vmatmul.mubr.msk.f32.vlgmr.msra.gmra.mrb[14].mxu1 %vm931_vm1, %v1423_v6  ;;  %v2704_v6 = vpack.c.bf16 %v1630_v30, %v1628_v29 }
 0x7e2   : > { %2481 = vmatprep.mubr.msk.f32.mxu1 %vm3213_vm0, %v3212_v2 }
 0x8b0   : > { %v3552_v4 = vpop.f32.mrb[12].mxu1 }
 0x8b1   : > { %v2473_v32 = vpop.f32.mrb[13].mxu1 }
 0x8b2   : > { %v1627_v32 = vld [vmem:[#allocation5 + $0xe0] sm:$0xff] }
 0x8b4   : > { %v1496_v33 = vpop.f32.mrb[14].mxu1 }
 0x8b5   : > { %v1500_v34 = vmul.f32 0.125, %v1496_v33  ;;  %v2478_v35 = vpop.f32.mrb[15].mxu1  ;;  %v1629_v33 = vld [vmem:[#allocation5 + $0xf0] sm:$0xff] }
 0x8b6   : > { %v1634_v35 = vld [vmem:[#allocation5 + $0x118] sm:$0xff] }
 0x8b7   : > { %v1501_v36 = vsel %vm1009_vm2, %v1500_v34, -inf }
 0x8b8   : > { %1502 = vmax.xlane.f32.xlu1 %v1501_v36  ;;  %v2706_v36 = vpack.c.bf16 %v1629_v33, %v1627_v32  ;;  %v1665_v32 = vlaneseq }
 0x8ba   : > { %v1666_v33 = vshrl.u32 %v1665_v32, 7  ;;  %v1831_v32 = vld [vmem:[#allocation7 + $0xf8] sm:$0xff] }
 0x8c9   : > { %1513 = vrot.lane.b32.xlu1 %v3507_v55, %s3214_s24  ;;  %v1605_v55 = vld [vmem:[#allocation5 + $0x30] sm:$0xff] }
 0x8ca   : > { %v2682_v58 = vpack.c.bf16 %v1605_v55, %v1603_v54  ;;  %v1643_v55 = vld [vmem:[#allocation5 + $0x160] sm:$0xff] }
 0x945   : > { %v1503_v37 = vpop.xlane.xlu1 %1502 }
 0x946   : > { %v1504_v38 = vsub.f32 %v1500_v34, %v1503_v37  ;;  %v1632_v34 = vld [vmem:[#allocation5 + $0x108] sm:$0xff] }
 0x947   : > { %v2708_v37 = vpack.c.bf16 %v1634_v35, %v1632_v34  ;;  %v3565_v34 = vsub.s32 0, %v1666_v33  ;;  %v3570_v35 = vsub.s32 1, %v1666_v33 }
 0x948   : > { %v1505_v39 = vmul.f32 1.442695, %v1504_v38  ;;  %v1631_v38 = vld [vmem:[#allocation5 + $0x100] sm:$0xff] }
 0x949   : > { %v1514_v40 = vpop.permute.xlu1 %1513 }
 0x94a   : > { %3004 = vpow2.f32 %v1505_v39  ;;  %2480 = vmatpush3.msra.mxu1 %v1514_v40  ;;  %v1633_v39 = vld [vmem:[#allocation5 + $0x110] sm:$0xff]  ;;  %v1636_v40 = vld [vmem:[#allocation5 + $0x128] sm:$0xff] }
 0x94b   : > { %2677 = vmatprep.subr.bf16.mxu1 %v2676_v48  ;;  %v2716_v48 = vpack.c.bf16 %v1642_v46, %v1640_v45  ;;  %v1802_v46 = vld [vmem:[#allocation7 + $0x10] sm:$0xff] }
 0x954   : > { %v3005_v41 = vpop.eup %3004 }
 0x955   : > { %v1507_v2 = vsel %vm1009_vm2, %v3005_v41, 0.0 }
 0x956   : > { %1508 = vadd.xlane.f32.xlu0 %v1507_v2  ;;  %v2710_v2 = vpack.c.bf16 %v1633_v39, %v1631_v38 }
 0x9e3   : > { %v1509_v42 = vpop.xlane.xlu0 %1508 }
 0x9e4   : > { %3006 = vrcp.f32 %v1509_v42 }
 0x9ee   : > { %v3007_v43 = vpop.eup %3006 }
 0x9ef   : > { %v1511_v44 = vmul.f32 %v3007_v43, %v3005_v41  ;;  %v1638_v41 = vld [vmem:[#allocation5 + $0x138] sm:$0xff]  ;;  %v1635_v43 = vld [vmem:[#allocation5 + $0x120] sm:$0xff] }
 0x9f0   : > { %v2712_v42 = vpack.c.bf16 %v1638_v41, %v1636_v40 }
 0x9f1   : > { %2482 = vmatmul.mubr.msk.f32.vlgmr.msra.gmra.mrb[16].mxu1 %vm1009_vm2, %v1511_v44  ;;  %v1637_v44 = vld [vmem:[#allocation5 + $0x130] sm:$0xff] }
 0x9f2   : > { %2679 = vmatpush1.bf16.msra.mxu1 %v2678_v52  ;;  %v2714_v47 = vpack.c.bf16 %v1637_v44, %v1635_v43  ;;  %v1646_v52 = vld [vmem:[#allocation5 + $0x178] sm:$0xff]  ;;  %v1800_v44 = vld [vmem:[#allocation7] sm:$0xff] }
 0x9f3   : > { %2681 = vmatprep.subr.bf16.mxu1 %v2680_v53  ;;  %v2718_v53 = vpack.c.bf16 %v1641_v50, %v1639_v49  ;;  %v2720_v54 = vpack.c.bf16 %v1646_v52, %v1644_v51  ;;  %v1803_v43 = vld [vmem:[#allocation7 + $0x18] sm:$0xff]  ;;  %v2742_v49 = vpack.c.bf16 %v1802_v46, %v1800_v44  ;;  %v1804_v51 = vld [vmem:[#allocation7 + $0x20] sm:$0xff]  ;;  %v1806_v52 = vld [vmem:[#allocation7 + $0x30] sm:$0xff] }
 0x9f4   : > { %v1836_v44 = vld [vmem:[#allocation7 + $0x120] sm:$0xff] }
 0x9f6   : > { %2683 = vmatpush1.bf16.msra.mxu1 %v2682_v58  ;;  %v1650_v58 = vld [vmem:[#allocation5 + $0x198] sm:$0xff] }
 0x9f7   : > { %2685 = vmatprep.subr.bf16.mxu1 %v2684_v59  ;;  %v2722_v59 = vpack.c.bf16 %v1645_v56, %v1643_v55  ;;  %v2724_v60 = vpack.c.bf16 %v1650_v58, %v1648_v57  ;;  %v1808_v55 = vld [vmem:[#allocation7 + $0x40] sm:$0xff]  ;;  %v1810_v56 = vld [vmem:[#allocation7 + $0x50] sm:$0xff]  ;;  %v1813_v57 = vld [vmem:[#allocation7 + $0x68] sm:$0xff] }
 0x9f8   : > { %v1815_v58 = vld [vmem:[#allocation7 + $0x78] sm:$0xff] }
 0x9fa   : > { %2687 = vmatpush1.bf16.msra.mxu1 %v2686_v3  ;;  %v1654_v3 = vld [vmem:[#allocation5 + $0x1b8] sm:$0xff] }
 0x9fb   : > { %2689 = vmatprep.subr.bf16.mxu1 %v2688_v5  ;;  %v2726_v5 = vpack.c.bf16 %v1649_v63, %v1647_v62  ;;  %v2728_v7 = vpack.c.bf16 %v1654_v3, %v1652_v0  ;;  %v1812_v62 = vld [vmem:[#allocation7 + $0x60] sm:$0xff]  ;;  %v1814_v63 = vld [vmem:[#allocation7 + $0x70] sm:$0xff]  ;;  %v1817_v0 = vld [vmem:[#allocation7 + $0x88] sm:$0xff] }
 0x9fc   : > { %v1819_v3 = vld [vmem:[#allocation7 + $0x98] sm:$0xff] }
 0x9fe   : > { %2691 = vmatpush1.bf16.msra.mxu1 %v2690_v11  ;;  %v1658_v11 = vld [vmem:[#allocation5 + $0x1d8] sm:$0xff] }
 0x9ff   : > { %2693 = vmatprep.subr.bf16.mxu1 %v2692_v12  ;;  %v2730_v12 = vpack.c.bf16 %v1653_v9, %v1651_v8  ;;  %v2732_v13 = vpack.c.bf16 %v1658_v11, %v1656_v10  ;;  %v1816_v8 = vld [vmem:[#allocation7 + $0x80] sm:$0xff]  ;;  %v1818_v9 = vld [vmem:[#allocation7 + $0x90] sm:$0xff]  ;;  %v1821_v10 = vld [vmem:[#allocation7 + $0xa8] sm:$0xff] }
 0xa00   : > { %v1823_v11 = vld [vmem:[#allocation7 + $0xb8] sm:$0xff] }
 0xa02   : > { %2695 = vmatpush1.bf16.msra.mxu1 %v2694_v19  ;;  %v1660_v19 = vld [vmem:[#allocation5 + $0x1e8] sm:$0xff] }
 0xa03   : > { %2697 = vmatprep.subr.bf16.mxu1 %v2696_v20  ;;  %v1662_v20 = vld [vmem:[#allocation5 + $0x1f8] sm:$0xff] }
 0xa04   : > { %v2736_v21 = vpack.c.bf16 %v1662_v20, %v1660_v19  ;;  %v1827_v19 = vld [vmem:[#allocation7 + $0xd8] sm:$0xff]  ;;  %v2762_v20 = vpack.c.bf16 %v1822_v15, %v1820_v14  ;;  %v1858_v14 = vld [vmem:[#allocation7 + $0x1d0] sm:$0xff]  ;;  %v1861_v15 = vld [vmem:[#allocation7 + $0x1e8] sm:$0xff] }
 0xa06   : > { %2699 = vmatpush1.bf16.msra.mxu1 %v2698_v25 }
 0xa07   : > { %2701 = vmatprep.subr.bf16.mxu1 %v2700_v26 }
 0xa0a   : > { %2703 = vmatpush1.bf16.msra.mxu1 %v2702_v31 }
 0xa0b   : > { %2705 = vmatprep.subr.bf16.mxu1 %v2704_v6 }
 0xa0e   : > { %2707 = vmatpush1.bf16.msra.mxu1 %v2706_v36 }
 0xa0f   : > { %2709 = vmatprep.subr.bf16.mxu1 %v2708_v37 }
 0xa12   : > { %2711 = vmatpush1.bf16.msra.mxu1 %v2710_v2 }
 0xa13   : > { %2713 = vmatprep.subr.bf16.mxu1 %v2712_v42  ;;  %v1801_v42 = vld [vmem:[#allocation7 + $0x8] sm:$0xff] }
 0xa14   : > { %v2740_v45 = vpack.c.bf16 %v1803_v43, %v1801_v42  ;;  %v1839_v42 = vld [vmem:[#allocation7 + $0x138] sm:$0xff] }
 0xa16   : > { %2715 = vmatpush1.bf16.msra.mxu1 %v2714_v47  ;;  %v1805_v47 = vld [vmem:[#allocation7 + $0x28] sm:$0xff]  ;;  %2741 = vmatprep.subr.bf16.mxu0 %v2740_v45  ;;  %v1838_v45 = vld [vmem:[#allocation7 + $0x130] sm:$0xff] }
 0xa17   : > { %2717 = vmatprep.subr.bf16.mxu1 %v2716_v48  ;;  %v1807_v48 = vld [vmem:[#allocation7 + $0x38] sm:$0xff]  ;;  %2743 = vmatpush1.bf16.msra.mxu0 %v2742_v49  ;;  %v2778_v46 = vpack.c.bf16 %v1838_v45, %v1836_v44  ;;  %v1961_v44 = vld [vmem:[#allocation8 + $0x60] sm:$0xff]  ;;  %v1963_v45 = vld [vmem:[#allocation8 + $0x70] sm:$0xff] }
 0xa18   : > { %v2744_v50 = vpack.c.bf16 %v1807_v48, %v1805_v47  ;;  %v1841_v47 = vld [vmem:[#allocation7 + $0x148] sm:$0xff]  ;;  %v1843_v48 = vld [vmem:[#allocation7 + $0x158] sm:$0xff] }
 0xa19   : > { %v2780_v49 = vpack.c.bf16 %v1843_v48, %v1841_v47  ;;  %v1968_v47 = vld [vmem:[#allocation8 + $0x98] sm:$0xff]  ;;  %v2818_v48 = vpack.c.bf16 %v1963_v45, %v1961_v44  ;;  %v2001_v44 = vld [vmem:[#allocation8 + $0x1a0] sm:$0xff]  ;;  %v2003_v45 = vld [vmem:[#allocation8 + $0x1b0] sm:$0xff] }
 0xa1a   : > { %2719 = vmatpush1.bf16.msra.mxu1 %v2718_v53  ;;  %v1809_v53 = vld [vmem:[#allocation7 + $0x48] sm:$0xff]  ;;  %2745 = vmatprep.subr.bf16.mxu0 %v2744_v50  ;;  %v1840_v50 = vld [vmem:[#allocation7 + $0x140] sm:$0xff] }
 0xa1b   : > { %2721 = vmatprep.subr.bf16.mxu1 %v2720_v54  ;;  %v1811_v54 = vld [vmem:[#allocation7 + $0x58] sm:$0xff] }
 0xa1e   : > { %2723 = vmatpush1.bf16.msra.mxu1 %v2722_v59  ;;  %v2750_v59 = vpack.c.bf16 %v1810_v56, %v1808_v55  ;;  %v1846_v55 = vld [vmem:[#allocation7 + $0x170] sm:$0xff]  ;;  %v1849_v56 = vld [vmem:[#allocation7 + $0x188] sm:$0xff] }
 0xa1f   : > { %2725 = vmatprep.subr.bf16.mxu1 %v2724_v60  ;;  %v2752_v60 = vpack.c.bf16 %v1815_v58, %v1813_v57  ;;  %v1851_v57 = vld [vmem:[#allocation7 + $0x198] sm:$0xff] }
 0xa22   : > { %2727 = vmatpush1.bf16.msra.mxu1 %v2726_v5  ;;  %v2754_v5 = vpack.c.bf16 %v1814_v63, %v1812_v62  ;;  %v1850_v62 = vld [vmem:[#allocation7 + $0x190] sm:$0xff]  ;;  %v1853_v63 = vld [vmem:[#allocation7 + $0x1a8] sm:$0xff] }
 0xa23   : > { %2729 = vmatprep.subr.bf16.mxu1 %v2728_v7  ;;  %v2756_v7 = vpack.c.bf16 %v1819_v3, %v1817_v0  ;;  %v1855_v0 = vld [vmem:[#allocation7 + $0x1b8] sm:$0xff] }
 0xa26   : > { %2731 = vmatpush1.bf16.msra.mxu1 %v2730_v12  ;;  %v2758_v12 = vpack.c.bf16 %v1818_v9, %v1816_v8  ;;  %v1854_v8 = vld [vmem:[#allocation7 + $0x1b0] sm:$0xff]  ;;  %v1857_v9 = vld [vmem:[#allocation7 + $0x1c8] sm:$0xff] }
 0xa27   : > { %2733 = vmatprep.subr.bf16.mxu1 %v2732_v13  ;;  %v2760_v13 = vpack.c.bf16 %v1823_v11, %v1821_v10  ;;  %v1859_v10 = vld [vmem:[#allocation7 + $0x1d8] sm:$0xff] }
 0xa2a   : > { %2735 = vmatpush1.bf16.msra.mxu1 %v2734_v18  ;;  %v1825_v18 = vld [vmem:[#allocation7 + $0xc8] sm:$0xff] }
 0xa2b   : > { %2737 = vmatprep.subr.bf16.mxu1 %v2736_v21  ;;  %v2764_v21 = vpack.c.bf16 %v1827_v19, %v1825_v18  ;;  %v1863_v18 = vld [vmem:[#allocation7 + $0x1f8] sm:$0xff] }
 0xa2e   : > { %2739 = vmatpush1.bf16.msra.mxu1 %v2738_v24  ;;  %v2766_v24 = vpack.c.bf16 %v1826_v23, %v1824_v22  ;;  %v1862_v22 = vld [vmem:[#allocation7 + $0x1f0] sm:$0xff] }
 0xac4   : > { %v1585_v25 = vpop.f32.mrb[16].mxu1 }
 0xac5   : > { %v2987_v26 = vpack.i.bf16 %v3536_v17, %v1585_v25  ;;  %v2483_v27 = vpop.f32.mrb[17].mxu1  ;;  %v1663_v17 = vld [vmem:[%s3775_s3] sm:$0x3] }
 0xac6   : > { %v1668_v36 = vrot.slane %v1663_v17, %v3565_v34  ;;  %v1672_v37 = vrot.slane %v1663_v17, %v3570_v35  ;;  %v1828_v17 = vld [vmem:[#allocation7 + $0xe0] sm:$0xff] }
 0xac7   : > { %2988 = vrot.lane.b32.xlu0 %v2987_v26, %s3214_s24  ;;  %s518_s24 = scalar_lea.vmem [#allocation10], %s517_s13 }
 0xac8   : > { %s2267_s19 = sshll.u32 %s518_s24, 4  ;;  %s3732_s19 = int_to_ptr.vmem [resolvable:$true] %s2267_s19 }
 0xac9   : > { %s3128_s16 = scalar_lea.vmem %s3732_s19, 16  ;;  %p3135_p8 = scmp.lt.s32.totalorder %s3732_s19, %s3133_s20 }
 0xaca   : > { %p3129_p2 = scmp.ne.s32.totalorder %s3732_s19, %s3128_s16  ;;  %p3136_p11 = scmp.lt.s32.totalorder %s3134_s15, %s3128_s16 }
 0xacc   : > { %p3130_p4 = pnand %p3129_p2, %p3831_p3  ;;  %p3137_p5 = por %p3136_p11, %p3135_p8 }
 0xace   : > { %p3131_p7 = pneg %p3130_p4 }
 0xad0   : > { %p3138_p0 = pnand %p3137_p5, %p3131_p7 }
 0xb39   : > { %v2989_v28 = vpop.permute.xlu0 %2988 }
 0xb3a   : > { %v2991_v29 = vunpack.i.h.bf16 %v2989_v28  ;;  %v2990_v30 = vunpack.i.l.bf16 %v2989_v28 }
 0xb3c   : > { %v1598_v31 = vsel %vm931_vm1, %v3552_v4, %v2990_v30  ;;  %v1597_v6 = vsel %vm931_vm1, %v3518_v61, %v2991_v29 }
 0xb3d   : > { %1739 = vmatprep.mubr.f32.mxu1 %v1598_v31 }
 0xb3e   : > { %1740 = vmatmul.mubr.f32.vlgmr.msra.gmra.mrb[18].mxu1 %v1597_v6  ;;  %v1829_v6 = vld [vmem:[#allocation7 + $0xe8] sm:$0xff] }
 0xb3f   : > { %v2768_v33 = vpack.c.bf16 %v1831_v32, %v1829_v6  ;;  %v1956_v6 = vld [vmem:[#allocation8 + $0x38] sm:$0xff] }
 0xc11   : > { %v1741_v4 = vpop.f32.mrb[18].mxu1 }
 0xc12   : > { %v1742_v38 = vadd.f32 %v1741_v4, %v1668_v36  ;;  %v1743_v39 = vpop.f32.mrb[19].mxu1  ;;  %v1830_v36 = vld [vmem:[#allocation7 + $0xf0] sm:$0xff]  ;;  %v1833_v4 = vld [vmem:[#allocation7 + $0x108] sm:$0xff] }
 0xc13   : > { %v1744_v61 = vadd.f32 %v1743_v39, %v1672_v37  ;;  %v2770_v37 = vpack.c.bf16 %v1830_v36, %v1828_v17  ;;  %v1953_v17 = vld [vmem:[#allocation8 + $0x20] sm:$0xff]  ;;  %v1955_v36 = vld [vmem:[#allocation8 + $0x30] sm:$0xff] }
 0xc14   : > { %v1746_v40 = vadd.f32 %v1742_v38, %v3485_v1  ;;  %v2746_v1 = vpack.c.bf16 %v1806_v52, %v1804_v51  ;;  %v1835_v38 = vld [vmem:[#allocation7 + $0x118] sm:$0xff]  ;;  %v1842_v51 = vld [vmem:[#allocation7 + $0x150] sm:$0xff] }
 0xc15   : > { %v1747_v41 = vadd.f32 %v1744_v61, %v3480_v16  ;;  %v2748_v16 = vpack.c.bf16 %v1811_v54, %v1809_v53  ;;  %v2772_v39 = vpack.c.bf16 %v1835_v38, %v1833_v4  ;;  %v1832_v61 = vld [vmem:[#allocation7 + $0x100] sm:$0xff]  ;;  %v2782_v52 = vpack.c.bf16 %v1842_v51, %v1840_v50  ;;  %v1845_v53 = vld [vmem:[#allocation7 + $0x168] sm:$0xff]  ;;  %v1847_v54 = vld [vmem:[#allocation7 + $0x178] sm:$0xff] }
 0xc16   : > { %2747 = vmatpush1.bf16.msra.mxu0 %v2746_v1  ;;  %v1844_v1 = vld [vmem:[#allocation7 + $0x160] sm:$0xff]  ;;  %v1960_v4 = vld [vmem:[#allocation8 + $0x58] sm:$0xff]  ;;  %v2810_v38 = vpack.c.bf16 %v1955_v36, %v1953_v17  ;;  %v1967_v51 = vld [vmem:[#allocation8 + $0x90] sm:$0xff] }
 0xc17   : > { %v1750_v2 = vadd.f32 %v1747_v41, %v1746_v40  ;;  %2749 = vmatprep.subr.bf16.mxu0 %v2748_v16  ;;  %v2784_v16 = vpack.c.bf16 %v1847_v54, %v1845_v53  ;;  %v2786_v58 = vpack.c.bf16 %v1846_v55, %v1844_v1  ;;  %v1965_v50 = vld [vmem:[#allocation8 + $0x80] sm:$0xff]  ;;  %v1972_v53 = vld [vmem:[#allocation8 + $0xb8] sm:$0xff]  ;;  %v1971_v55 = vld [vmem:[#allocation8 + $0xb0] sm:$0xff] }
 0xc18   : > { %v2822_v54 = vpack.c.bf16 %v1967_v51, %v1965_v50  ;;  %v1993_v17 = vld [vmem:[#allocation8 + $0x160] sm:$0xff]  ;;  %v1995_v36 = vld [vmem:[#allocation8 + $0x170] sm:$0xff] }
 0xc19   : > { %1751 = vadd.xlane.f32.xlu1 %v1750_v2  ;;  %v1837_v2 = vld [vmem:[#allocation7 + $0x128] sm:$0xff] }
 0xc1a   : > { %2751 = vmatpush1.bf16.msra.mxu0 %v2750_v59  ;;  %v2776_v43 = vpack.c.bf16 %v1839_v42, %v1837_v2  ;;  %v2788_v59 = vpack.c.bf16 %v1851_v57, %v1849_v56  ;;  %v1964_v2 = vld [vmem:[#allocation8 + $0x78] sm:$0xff]  ;;  %v1974_v56 = vld [vmem:[#allocation8 + $0xc8] sm:$0xff] }
 0xc1b   : > { %2753 = vmatprep.subr.bf16.mxu0 %v2752_v60  ;;  %v1848_v60 = vld [vmem:[#allocation7 + $0x180] sm:$0xff]  ;;  %v1976_v57 = vld [vmem:[#allocation8 + $0xd8] sm:$0xff] }
 0xc1c   : > { %v2790_v3 = vpack.c.bf16 %v1850_v62, %v1848_v60  ;;  %v1973_v60 = vld [vmem:[#allocation8 + $0xc0] sm:$0xff]  ;;  %v1975_v62 = vld [vmem:[#allocation8 + $0xd0] sm:$0xff] }
 0xc1e   : > { %2755 = vmatpush1.bf16.msra.mxu0 %v2754_v5  ;;  %v2792_v5 = vpack.c.bf16 %v1855_v0, %v1853_v63  ;;  %v1978_v63 = vld [vmem:[#allocation8 + $0xe8] sm:$0xff]  ;;  %v1980_v0 = vld [vmem:[#allocation8 + $0xf8] sm:$0xff] }
 0xc1f   : > { %2757 = vmatprep.subr.bf16.mxu0 %v2756_v7  ;;  %v1852_v7 = vld [vmem:[#allocation7 + $0x1a0] sm:$0xff] }
 0xc20   : > { %v2794_v11 = vpack.c.bf16 %v1854_v8, %v1852_v7  ;;  %v1977_v7 = vld [vmem:[#allocation8 + $0xe0] sm:$0xff]  ;;  %v1979_v8 = vld [vmem:[#allocation8 + $0xf0] sm:$0xff] }
 0xc22   : > { %2759 = vmatpush1.bf16.msra.mxu0 %v2758_v12  ;;  %v2796_v12 = vpack.c.bf16 %v1859_v10, %v1857_v9  ;;  %v1982_v9 = vld [vmem:[#allocation8 + $0x108] sm:$0xff]  ;;  %v1984_v10 = vld [vmem:[#allocation8 + $0x118] sm:$0xff] }
 0xc23   : > { %2761 = vmatprep.subr.bf16.mxu0 %v2760_v13  ;;  %v1856_v13 = vld [vmem:[#allocation7 + $0x1c0] sm:$0xff] }
 0xc24   : > { %v2798_v19 = vpack.c.bf16 %v1858_v14, %v1856_v13  ;;  %v1981_v13 = vld [vmem:[#allocation8 + $0x100] sm:$0xff]  ;;  %v1983_v14 = vld [vmem:[#allocation8 + $0x110] sm:$0xff] }
 0xc26   : > { %2763 = vmatpush1.bf16.msra.mxu0 %v2762_v20  ;;  %v2800_v20 = vpack.c.bf16 %v1863_v18, %v1861_v15  ;;  %v1986_v15 = vld [vmem:[#allocation8 + $0x128] sm:$0xff]  ;;  %v1988_v18 = vld [vmem:[#allocation8 + $0x138] sm:$0xff] }
 0xc27   : > { %2765 = vmatprep.subr.bf16.mxu0 %v2764_v21  ;;  %v1860_v21 = vld [vmem:[#allocation7 + $0x1e0] sm:$0xff] }
 0xc28   : > { %v2802_v23 = vpack.c.bf16 %v1862_v22, %v1860_v21  ;;  %v1985_v21 = vld [vmem:[#allocation8 + $0x120] sm:$0xff]  ;;  %v1987_v22 = vld [vmem:[#allocation8 + $0x130] sm:$0xff] }
 0xc2a   : > { %2767 = vmatpush1.bf16.msra.mxu0 %v2766_v24  ;;  %v1950_v24 = vld [vmem:[#allocation8 + $0x8] sm:$0xff] }
 0xc2b   : > { %2769 = vmatprep.subr.bf16.mxu0 %v2768_v33 }
 0xc2e   : > { %2771 = vmatpush1.bf16.msra.mxu0 %v2770_v37  ;;  %v1958_v37 = vld [vmem:[#allocation8 + $0x48] sm:$0xff] }
 0xc2f   : > { %2773 = vmatprep.subr.bf16.mxu0 %v2772_v39  ;;  %v2812_v39 = vpack.c.bf16 %v1960_v4, %v1958_v37  ;;  %v1998_v37 = vld [vmem:[#allocation8 + $0x188] sm:$0xff]  ;;  %v2000_v4 = vld [vmem:[#allocation8 + $0x198] sm:$0xff] }
 0xca6   : > { %v1752_v25 = vpop.xlane.xlu1 %1751 }
 0xca7   : > { %v1754_v26 = vmul.f32 0.00390625, %v1752_v25  ;;  %v1952_v25 = vld [vmem:[#allocation8 + $0x18] sm:$0xff] }
 0xca9   : > { %v3576_v27 = vsub.f32 %v1746_v40, %v1754_v26  ;;  %v3578_v28 = vsub.f32 %v1747_v41, %v1754_v26  ;;  %v1834_v40 = vld [vmem:[#allocation7 + $0x110] sm:$0xff]  ;;  %v1949_v26 = vld [vmem:[#allocation8] sm:$0xff] }
 0xcaa   : > { %v2774_v41 = vpack.c.bf16 %v1834_v40, %v1832_v61  ;;  %v1957_v61 = vld [vmem:[#allocation8 + $0x40] sm:$0xff]  ;;  %v1959_v40 = vld [vmem:[#allocation8 + $0x50] sm:$0xff] }
 0xcab   : > { %v1757_v29 = vmul.f32 %v3576_v27, %v3576_v27  ;;  %v1758_v30 = vmul.f32 %v3578_v28, %v3578_v28  ;;  %v2814_v42 = vpack.c.bf16 %v1959_v40, %v1957_v61  ;;  %v1997_v61 = vld [vmem:[#allocation8 + $0x180] sm:$0xff]  ;;  %v1999_v40 = vld [vmem:[#allocation8 + $0x190] sm:$0xff] }
 0xcac   : > { %2775 = vmatpush1.bf16.msra.mxu0 %v2774_v41  ;;  %v1962_v41 = vld [vmem:[#allocation8 + $0x68] sm:$0xff] }
 0xcad   : > { %v1759_v31 = vadd.f32 %v1758_v30, %v1757_v29  ;;  %2777 = vmatprep.subr.bf16.mxu0 %v2776_v43  ;;  %v2804_v29 = vpack.c.bf16 %v1952_v25, %v1950_v24  ;;  %v1951_v30 = vld [vmem:[#allocation8 + $0x10] sm:$0xff]  ;;  %v2816_v43 = vpack.c.bf16 %v1964_v2, %v1962_v41  ;;  %v1992_v24 = vld [vmem:[#allocation8 + $0x158] sm:$0xff]  ;;  %v2842_v25 = vpack.c.bf16 %v1987_v22, %v1985_v21  ;;  %v2002_v41 = vld [vmem:[#allocation8 + $0x1a8] sm:$0xff] }
 0xcae   : > { %v2806_v32 = vpack.c.bf16 %v1951_v30, %v1949_v26  ;;  %v1991_v30 = vld [vmem:[#allocation8 + $0x150] sm:$0xff]  ;;  %v2004_v2 = vld [vmem:[#allocation8 + $0x1b8] sm:$0xff] }
 0xcaf   : > { %1760 = vadd.xlane.f32.xlu0 %v1759_v31  ;;  %v1954_v31 = vld [vmem:[#allocation8 + $0x28] sm:$0xff]  ;;  %2805 = vmatprep.subr.bf16.mxu1 %v2804_v29  ;;  %v1989_v29 = vld [vmem:[#allocation8 + $0x140] sm:$0xff] }
 0xcb0   : > { %2779 = vmatpush1.bf16.msra.mxu0 %v2778_v46  ;;  %v2808_v33 = vpack.c.bf16 %v1956_v6, %v1954_v31  ;;  %2807 = vmatpush1.bf16.msra.mxu1 %v2806_v32  ;;  %v1966_v46 = vld [vmem:[#allocation8 + $0x88] sm:$0xff]  ;;  %v1996_v6 = vld [vmem:[#allocation8 + $0x178] sm:$0xff]  ;;  %v2846_v32 = vpack.c.bf16 %v1991_v30, %v1989_v29  ;;  %v2013_v30 = vld [vmem:[%s3781_s9] sm:$0x3] }
 0xcb1   : > { %2781 = vmatprep.subr.bf16.mxu0 %v2780_v49  ;;  %v2820_v49 = vpack.c.bf16 %v1968_v47, %v1966_v46  ;;  %v1994_v31 = vld [vmem:[#allocation8 + $0x168] sm:$0xff]  ;;  %v2008_v47 = vld [vmem:[#allocation8 + $0x1d8] sm:$0xff] }
 0xcb2   : > { %2809 = vmatprep.subr.bf16.mxu1 %v2808_v33  ;;  %v2848_v33 = vpack.c.bf16 %v1996_v6, %v1994_v31  ;;  %v2006_v46 = vld [vmem:[#allocation8 + $0x1c8] sm:$0xff]  ;;  %v2018_v31 = vrot.slane %v2013_v30, %v3565_v34  ;;  %v2022_v6 = vrot.slane %v2013_v30, %v3570_v35  ;;  %v2163_v30 = vld [vmem:[%s3784_s12 + $0x70] sm:$0xff] }
 0xcb4   : > { %2783 = vmatpush1.bf16.msra.mxu0 %v2782_v52  ;;  %2811 = vmatpush1.bf16.msra.mxu1 %v2810_v38  ;;  %v1970_v52 = vld [vmem:[#allocation8 + $0xa8] sm:$0xff]  ;;  %v2850_v38 = vpack.c.bf16 %v1995_v36, %v1993_v17 }
 0xcb5   : > { %2785 = vmatprep.subr.bf16.mxu0 %v2784_v16  ;;  %2813 = vmatprep.subr.bf16.mxu1 %v2812_v39  ;;  %v2824_v1 = vpack.c.bf16 %v1972_v53, %v1970_v52  ;;  %v1969_v16 = vld [vmem:[#allocation8 + $0xa0] sm:$0xff]  ;;  %v2852_v39 = vpack.c.bf16 %v2000_v4, %v1998_v37 }
 0xcb8   : > { %2787 = vmatpush1.bf16.msra.mxu0 %v2786_v58  ;;  %2815 = vmatpush1.bf16.msra.mxu1 %v2814_v42  ;;  %v2826_v58 = vpack.c.bf16 %v1971_v55, %v1969_v16  ;;  %v2854_v42 = vpack.c.bf16 %v1999_v40, %v1997_v61 }
 0xcb9   : > { %2789 = vmatprep.subr.bf16.mxu0 %v2788_v59  ;;  %2817 = vmatprep.subr.bf16.mxu1 %v2816_v43  ;;  %v2828_v59 = vpack.c.bf16 %v1976_v57, %v1974_v56  ;;  %v2856_v43 = vpack.c.bf16 %v2004_v2, %v2002_v41  ;;  %v1748_v56 = vld [vmem:[%s3776_s4] sm:$0x3] }
 0xcba   : > { %v1749_v57 = vld [vmem:[%s3777_s5] sm:$0x3] }
 0xcbc   : > { %2791 = vmatpush1.bf16.msra.mxu0 %v2790_v3  ;;  %2819 = vmatpush1.bf16.msra.mxu1 %v2818_v48  ;;  %v2830_v3 = vpack.c.bf16 %v1975_v62, %v1973_v60  ;;  %v2858_v48 = vpack.c.bf16 %v2003_v45, %v2001_v44  ;;  %v2165_v44 = vld [vmem:[%s3784_s12 + $0x80] sm:$0xff]  ;;  %v2166_v45 = vld [vmem:[%s3784_s12 + $0x88] sm:$0xff] }
 0xcbd   : > { %2793 = vmatprep.subr.bf16.mxu0 %v2792_v5  ;;  %2821 = vmatprep.subr.bf16.mxu1 %v2820_v49  ;;  %v2832_v5 = vpack.c.bf16 %v1980_v0, %v1978_v63  ;;  %v2860_v49 = vpack.c.bf16 %v2008_v47, %v2006_v46  ;;  %v1791_v63 = vrot.slane %v1749_v57, %v3565_v34  ;;  %v2149_v47 = vld [vmem:[%s3784_s12] sm:$0xff] }
 0xcbe   : > { %v1795_v0 = vrot.slane %v1749_v57, %v3570_v35  ;;  %v2868_v46 = vpack.c.bf16 %v2166_v45, %v2165_v44  ;;  %v2153_v57 = vld [vmem:[%s3784_s12 + $0x20] sm:$0xff] }
 0xcc0   : > { %2795 = vmatpush1.bf16.msra.mxu0 %v2794_v11  ;;  %2823 = vmatpush1.bf16.msra.mxu1 %v2822_v54  ;;  %v2834_v11 = vpack.c.bf16 %v1979_v8, %v1977_v7 }
 0xcc1   : > { %2797 = vmatprep.subr.bf16.mxu0 %v2796_v12  ;;  %2825 = vmatprep.subr.bf16.mxu1 %v2824_v1  ;;  %v2836_v12 = vpack.c.bf16 %v1984_v10, %v1982_v9  ;;  %v2005_v10 = vld [vmem:[#allocation8 + $0x1c0] sm:$0xff] }
 0xcc4   : > { %2799 = vmatpush1.bf16.msra.mxu0 %v2798_v19  ;;  %2827 = vmatpush1.bf16.msra.mxu1 %v2826_v58  ;;  %v2838_v19 = vpack.c.bf16 %v1983_v14, %v1981_v13  ;;  %v1778_v58 = vrot.slane %v1748_v56, %v3565_v34  ;;  %v2010_v13 = vld [vmem:[#allocation8 + $0x1e8] sm:$0xff]  ;;  %v2012_v14 = vld [vmem:[#allocation8 + $0x1f8] sm:$0xff] }
 0xcc5   : > { %2801 = vmatprep.subr.bf16.mxu0 %v2800_v20  ;;  %2829 = vmatprep.subr.bf16.mxu1 %v2828_v59  ;;  %v2840_v20 = vpack.c.bf16 %v1988_v18, %v1986_v15  ;;  %v1782_v59 = vrot.slane %v1748_v56, %v3570_v35  ;;  %v2864_v15 = vpack.c.bf16 %v2012_v14, %v2010_v13  ;;  %v2011_v18 = vld [vmem:[#allocation8 + $0x1f0] sm:$0xff]  ;;  %v2176_v13 = vld [vmem:[%s3784_s12 + $0xd8] sm:$0xff] }
 0xcc8   : > { %2803 = vmatpush1.bf16.msra.mxu0 %v2802_v23  ;;  %2831 = vmatpush1.bf16.msra.mxu1 %v2830_v3  ;;  %v1990_v23 = vld [vmem:[#allocation8 + $0x148] sm:$0xff] }
 0xcc9   : > { %2833 = vmatprep.subr.bf16.mxu1 %v2832_v5  ;;  %v2844_v26 = vpack.c.bf16 %v1992_v24, %v1990_v23  ;;  %2869 = vmatprep.subr.bf16.mxu0 %v2868_v46 }
 0xccc   : > { %2835 = vmatpush1.bf16.msra.mxu1 %v2834_v11  ;;  %v2007_v11 = vld [vmem:[#allocation8 + $0x1d0] sm:$0xff] }
 0xccd   : > { %2837 = vmatprep.subr.bf16.mxu1 %v2836_v12  ;;  %v2862_v12 = vpack.c.bf16 %v2007_v11, %v2005_v10  ;;  %v2157_v10 = vld [vmem:[%s3784_s12 + $0x40] sm:$0xff]  ;;  %v2158_v11 = vld [vmem:[%s3784_s12 + $0x48] sm:$0xff] }
 0xcce   : > { %v2886_v14 = vpack.c.bf16 %v2158_v11, %v2157_v10 }
 0xcd0   : > { %2839 = vmatpush1.bf16.msra.mxu1 %v2838_v19 }
 0xcd1   : > { %2841 = vmatprep.subr.bf16.mxu1 %v2840_v20 }
 0xcd4   : > { %2843 = vmatpush1.bf16.msra.mxu1 %v2842_v25 }
 0xcd5   : > { %2845 = vmatprep.subr.bf16.mxu1 %v2844_v26 }
 0xcd8   : > { %2847 = vmatpush1.bf16.msra.mxu1 %v2846_v32 }
 0xcd9   : > { %2849 = vmatprep.subr.bf16.mxu1 %v2848_v33 }
 0xcdc   : > { %2851 = vmatpush1.bf16.msra.mxu1 %v2850_v38 }
 0xcdd   : > { %2853 = vmatprep.subr.bf16.mxu1 %v2852_v39 }
 0xce0   : > { %2855 = vmatpush1.bf16.msra.mxu1 %v2854_v42 }
 0xce1   : > { %2857 = vmatprep.subr.bf16.mxu1 %v2856_v43 }
 0xce4   : > { %2859 = vmatpush1.bf16.msra.mxu1 %v2858_v48  ;;  %v2150_v48 = vld [vmem:[%s3784_s12 + $0x8] sm:$0xff] }
 0xce5   : > { %2861 = vmatprep.subr.bf16.mxu1 %v2860_v49  ;;  %v2870_v49 = vpack.c.bf16 %v2150_v48, %v2149_v47 }
 0xce8   : > { %2863 = vmatpush1.bf16.msra.mxu1 %v2862_v12  ;;  %v2175_v12 = vld [vmem:[%s3784_s12 + $0xd0] sm:$0xff] }
 0xce9   : > { %2865 = vmatprep.subr.bf16.mxu1 %v2864_v15  ;;  %v2888_v15 = vpack.c.bf16 %v2176_v13, %v2175_v12 }
 0xd3c   : > { %v1761_v50 = vpop.xlane.xlu0 %1760 }
 0xd3d   : > { %v1762_v51 = vmul.f32 0.003921569, %v1761_v50  ;;  %v2167_v50 = vld [vmem:[%s3784_s12 + $0x90] sm:$0xff] }
 0xd3f   : > { %3008 = vrsqrt.f32 %v1762_v51  ;;  %vm1765_vm3 = vcmp.eq.f32.partialorder %v1762_v51, inf  ;;  %v1768_v54 = vand.u32 2147483648, %v1762_v51  ;;  %vm1767_vm4 = vcmp.eq.f32.partialorder %v1762_v51, 0.0 }
 0xd49   : > { %v3009_v52 = vpop.eup %3008 }
 0xd4a   : > { %v1764_v53 = vmul.f32 %v3009_v52, %v1762_v51 }
 0xd4c   : > { %v1766_v1 = vsel %vm1765_vm3, %v1762_v51, %v1764_v53  ;;  %v2168_v51 = vld [vmem:[%s3784_s12 + $0x98] sm:$0xff]  ;;  %v2151_v53 = vld [vmem:[%s3784_s12 + $0x10] sm:$0xff] }
 0xd4d   : > { %v1769_v16 = vsel %vm1767_vm4, %v1768_v54, %v1766_v1  ;;  %v2872_v52 = vpack.c.bf16 %v2168_v51, %v2167_v50  ;;  %v2152_v54 = vld [vmem:[%s3784_s12 + $0x18] sm:$0xff] }
 0xd4e   : > { %v1770_v55 = vadd.f32 0.001, %v1769_v16  ;;  %v2874_v1 = vpack.c.bf16 %v2152_v54, %v2151_v53  ;;  %v2169_v16 = vld [vmem:[%s3784_s12 + $0xa0] sm:$0xff] }
 0xd4f   : > { %v2181_v54 = vld [vmem:[%s3829_s18] sm:$0x1] }
 0xd50   : > { %3010 = vrcp.f32 %v1770_v55  ;;  %v2170_v55 = vld [vmem:[%s3784_s12 + $0xa8] sm:$0xff] }
 0xd51   : > { %v2876_v56 = vpack.c.bf16 %v2170_v55, %v2169_v16 }
 0xd5a   : > { %v3011_v60 = vpop.eup %3010 }
 0xd5b   : > { %v1773_v62 = vmul.f32 %v3011_v60, %v3578_v28  ;;  %v1772_v3 = vmul.f32 %v3011_v60, %v3576_v27  ;;  %v2009_v28 = vld [vmem:[#allocation8 + $0x1e0] sm:$0xff]  ;;  %v2171_v60 = vld [vmem:[%s3784_s12 + $0xb0] sm:$0xff] }
 0xd5c   : > { %v2866_v19 = vpack.c.bf16 %v2011_v18, %v2009_v28  ;;  %v1864_v27 = vld [vmem:[%s3779_s7] sm:$0x3]  ;;  %v2159_v28 = vld [vmem:[%s3784_s12 + $0x50] sm:$0xff]  ;;  %v2160_v18 = vld [vmem:[%s3784_s12 + $0x58] sm:$0xff] }
 0xd5d   : > { %v1786_v5 = vmul.f32 %v1782_v59, %v1773_v62  ;;  %v1785_v7 = vmul.f32 %v1778_v58, %v1772_v3  ;;  %v1869_v20 = vrot.slane %v1864_v27, %v3565_v34  ;;  %v1873_v21 = vrot.slane %v1864_v27, %v3570_v35  ;;  %v2154_v58 = vld [vmem:[%s3784_s12 + $0x28] sm:$0xff]  ;;  %v2172_v62 = vld [vmem:[%s3784_s12 + $0xb8] sm:$0xff] }
 0xd5e   : > { %2867 = vmatpush1.bf16.msra.mxu1 %v2866_v19  ;;  %v2878_v59 = vpack.c.bf16 %v2154_v58, %v2153_v57  ;;  %v2156_v3 = vld [vmem:[%s3784_s12 + $0x38] sm:$0xff]  ;;  %v2177_v19 = vld [vmem:[%s3784_s12 + $0xe0] sm:$0xff]  ;;  %v2178_v27 = vld [vmem:[%s3784_s12 + $0xe8] sm:$0xff] }
 0xd5f   : > { %v1799_v8 = vadd.f32 %v1795_v0, %v1786_v5  ;;  %v1798_v9 = vadd.f32 %v1791_v63, %v1785_v7  ;;  %v2155_v63 = vld [vmem:[%s3784_s12 + $0x30] sm:$0xff]  ;;  %v2880_v0 = vpack.c.bf16 %v2172_v62, %v2171_v60  ;;  %v2173_v5 = vld [vmem:[%s3784_s12 + $0xc0] sm:$0xff]  ;;  %v2174_v7 = vld [vmem:[%s3784_s12 + $0xc8] sm:$0xff] }
 0xd61   : > { %1940 = vmatprep.mubr.f32.mxu0 %v1799_v8 }
 0xd62   : > { %1941 = vmatmul.mubr.f32.vlgmr.msra.gmra.mrb[4].mxu0 %v1798_v9 }
 0xd63   : > { %2871 = vmatpush3.bf16.msra.mxu0 %v2870_v49 }
 0xd64   : > { %2873 = vmatprep.subr.bf16.mxu0 %v2872_v52 }
 0xd67   : > { %2875 = vmatpush3.bf16.msra.mxu0 %v2874_v1 }
 0xd68   : > { %2877 = vmatprep.subr.bf16.mxu0 %v2876_v56 }
 0xd6b   : > { %2879 = vmatpush3.bf16.msra.mxu0 %v2878_v59 }
 0xd6c   : > { %2881 = vmatprep.subr.bf16.mxu0 %v2880_v0 }
 0xe35   : > { %v1942_v22 = vpop.f32.mrb[4].mxu0 }
 0xe36   : > { %v1943_v23 = vadd.f32 %v1942_v22, %v1869_v20  ;;  %v1944_v24 = vpop.f32.mrb[5].mxu0  ;;  %v2890_v20 = vpack.c.bf16 %v2160_v18, %v2159_v28  ;;  %v2161_v22 = vld [vmem:[%s3784_s12 + $0x60] sm:$0xff] }
 0xe37   : > { %v1945_v25 = vadd.f32 %v1944_v24, %v1873_v21  ;;  %v2892_v21 = vpack.c.bf16 %v2178_v27, %v2177_v19  ;;  %v2179_v24 = vld [vmem:[%s3784_s12 + $0xf0] sm:$0xff] }
 0xe38   : > { %v1947_v29 = vmax.f32 %v1943_v23, 0.0  ;;  %v2162_v23 = vld [vmem:[%s3784_s12 + $0x68] sm:$0xff] }
 0xe39   : > { %v1948_v26 = vmax.f32 %v1945_v25, 0.0  ;;  %v2180_v25 = vld [vmem:[%s3784_s12 + $0xf8] sm:$0xff] }
 0xe3b   : > { %2089 = vmatprep.mubr.f32.mxu1 %v1948_v26  ;;  %v2894_v26 = vpack.c.bf16 %v2162_v23, %v2161_v22 }
 0xe3c   : > { %2090 = vmatmul.mubr.f32.vlgmr.msra.gmra.mrb[20].mxu1 %v1947_v29  ;;  %v2896_v29 = vpack.c.bf16 %v2180_v25, %v2179_v24 }
 0xf0f   : > { %v2091_v32 = vpop.f32.mrb[20].mxu1 }
 0xf10   : > { %v2092_v33 = vadd.f32 %v2091_v32, %v2018_v31  ;;  %v2093_v17 = vpop.f32.mrb[21].mxu1  ;;  %v2164_v31 = vld [vmem:[%s3784_s12 + $0x78] sm:$0xff] }
 0xf11   : > { %v2094_v36 = vadd.f32 %v2093_v17, %v2022_v6  ;;  %v2898_v6 = vpack.c.bf16 %v2164_v31, %v2163_v30 }
 0xf12   : > { %v2096_v37 = vadd.f32 %v2092_v33, %v1798_v9  ;;  %v2884_v9 = vpack.c.bf16 %v2174_v7, %v2173_v5 }
 0xf13   : > { %v2097_v4 = vadd.f32 %v2094_v36, %v1799_v8  ;;  %v2882_v8 = vpack.c.bf16 %v2156_v3, %v2155_v63 }
 0xf15   : > { %v2100_v38 = vadd.f32 %v2097_v4, %v2096_v37  ;;  %2883 = vmatpush3.bf16.msra.mxu0 %v2882_v8 }
 0xf16   : > { %2885 = vmatprep.subr.bf16.mxu0 %v2884_v9 }
 0xf17   : > { %2101 = vadd.xlane.f32.xlu1 %v2100_v38 }
 0xf19   : > { %2887 = vmatpush3.bf16.msra.mxu0 %v2886_v14 }
 0xf1a   : > { %2889 = vmatprep.subr.bf16.mxu0 %v2888_v15 }
 0xf1d   : > { %2891 = vmatpush3.bf16.msra.mxu0 %v2890_v20 }
 0xf1e   : > { %2893 = vmatprep.subr.bf16.mxu0 %v2892_v21 }
 0xf21   : > { %2895 = vmatpush3.bf16.msra.mxu0 %v2894_v26 }
 0xf22   : > { %2897 = vmatprep.subr.bf16.mxu0 %v2896_v29 }
 0xf25   : > { %2899 = vmatpush3.bf16.msra.mxu0 %v2898_v6 }
 0xfa4   : > { %v2102_v39 = vpop.xlane.xlu1 %2101 }
 0xfa5   : > { %v2103_v61 = vmul.f32 0.00390625, %v2102_v39 }
 0xfa7   : > { %v3606_v40 = vsub.f32 %v2096_v37, %v2103_v61  ;;  %v3608_v41 = vsub.f32 %v2097_v4, %v2103_v61  ;;  %v2098_v61 = vld [vmem:[%s3782_s10] sm:$0x3] }
 0xfa9   : > { %v2106_v2 = vmul.f32 %v3606_v40, %v3606_v40  ;;  %v2107_v42 = vmul.f32 %v3608_v41, %v3608_v41 }
 0xfab   : > { %v2108_v43 = vadd.f32 %v2107_v42, %v2106_v2  ;;  %v2099_v2 = vld [vmem:[%s3783_s11] sm:$0x3]  ;;  %v2127_v42 = vrot.slane %v2098_v61, %v3565_v34 }
 0xfac   : > { %v2140_v46 = vrot.slane %v2099_v2, %v3565_v34  ;;  %v2144_v47 = vrot.slane %v2099_v2, %v3570_v35 }
 0xfad   : > { %2109 = vadd.xlane.f32.xlu1 %v2108_v43  ;;  %v2131_v43 = vrot.slane %v2098_v61, %v3570_v35 }
0x103a   : > { %v2110_v32 = vpop.xlane.xlu1 %2109 }
0x103b   : > { %v2111_v33 = vmul.f32 0.003921569, %v2110_v32 }
0x103d   : > { %3012 = vrsqrt.f32 %v2111_v33  ;;  %vm2114_vm5 = vcmp.eq.f32.partialorder %v2111_v33, inf  ;;  %v2117_v37 = vand.u32 2147483648, %v2111_v33  ;;  %vm2116_vm6 = vcmp.eq.f32.partialorder %v2111_v33, 0.0 }
0x1047   : > { %v3013_v17 = vpop.eup %3012 }
0x1048   : > { %v2113_v36 = vmul.f32 %v3013_v17, %v2111_v33 }
0x104a   : > { %v2115_v4 = vsel %vm2114_vm5, %v2111_v33, %v2113_v36 }
0x104b   : > { %v2118_v38 = vsel %vm2116_vm6, %v2117_v37, %v2115_v4 }
0x104c   : > { %v2119_v39 = vadd.f32 0.001, %v2118_v38 }
0x104e   : > { %3014 = vrcp.f32 %v2119_v39 }
0x1058   : > { %v3015_v44 = vpop.eup %3014 }
0x1059   : > { %v2122_v45 = vmul.f32 %v3015_v44, %v3608_v41  ;;  %v2121_v48 = vmul.f32 %v3015_v44, %v3606_v40 }
0x105b   : > { %v2135_v49 = vmul.f32 %v2131_v43, %v2122_v45  ;;  %v2134_v50 = vmul.f32 %v2127_v42, %v2121_v48 }
0x105d   : > { %v2148_v51 = vadd.f32 %v2144_v47, %v2135_v49  ;;  %v2147_v52 = vadd.f32 %v2140_v46, %v2134_v50 }
0x105f   : > { %2246 = vmatprep.mubr.f32.mxu0 %v2148_v51 }
0x1060   : > { %2247 = vmatmul.mubr.f32.vlgmr.msra.gmra.mrb[6].mxu0 %v2147_v52 }
0x1133   : > { %v2441_v53 = vpop.f32.mrb[6].mxu0 }
0x1134   : > { %v2442_v41 = vpop.f32.mrb[7].mxu0 }
0x1135   : > { %v2443_v34 = vadd.f32 %v2442_v41, %v2441_v53 }
0x1137   : > { %v2249_v35 = vadd.f32 %v2443_v34, %v2181_v54 }
0x1139   : > { %2253 = vst.msk [vmem:[%s518_s24] sm:$0x1] %vm2252_vm7, %v2249_v35 }
0x113a   : > { %3141 = shalt.err (!%p3138_p0)
}
0x113b   : > { %s3142_s14 = scalar_lea.hbm %s3730_s22, 16  ;;  %s3146_s26 = scalar_lea.hbm %s3830_s21, 32 }
0x113c   : > { %p3143_p6 = scmp.ne.s32.totalorder %s3730_s22, %s3142_s14  ;;  %p3147_p13 = scmp.lt.u32.totalorder %s3730_s22, %s3830_s21 }
0x113d   : > { %p3148_p12 = scmp.lt.u32.totalorder %s3146_s26, %s3142_s14  ;;  %p3150_p2 = scmp.lt.u32.totalorder %s3142_s14, %s3730_s22 }
0x113e   : > { %p3144_p9 = pnand %p3143_p6, %p3831_p3 }
0x113f   : > { %p3149_p1 = por %p3148_p12, %p3147_p13 }
0x1140   : > { %p3145_p10 = pneg %p3144_p9 }
0x1141   : > { %p3151_p4 = por %p3150_p2, %p3149_p1 }
0x1143   : > { %p3152_p7 = pnand %p3151_p4, %p3145_p10 }
0x1145   : > { %3155 = shalt.err (!%p3152_p7)
}
0x1146   : > { %2916 = dma.vmem_to_hbm [thread:$0]  (%p3831_p3), %s3732_s19, 16, %s3730_s22, %s2255_s27  }
0x1147 PF: > { %s3832_s24 = sld [smem:[#allocation17_spill]]  ;;  %s3833_s23 = sld [smem:[#allocation15_spill]] }
0x1148   : > { %s3834_s29 = sld [smem:[#allocation21_spill]] }
0x114d   : > { %p2943_p8 = scmp.ge.s32.totalorder %s3832_s24, 2  ;;  %s2279_s16 = sand.u32 1, %s3833_s23  }
0x114e   : > { %p3835_p11 = scmp.ne.s32.totalorder %s3834_s29, 0  ;;  %s2280_s17 = scalar_lea.sflag [#allocation4], %s2279_s16 }
0x1150   : > { %p2932_p5 = pnand %p2943_p8, %p3835_p11 }
0x1152   : > { %3185 = dma.done.wait (!%p2932_p5), %s2280_s17, 16  }
0x1153   : > { %3187 = vsyncadd (!%p2932_p5), %s2280_s17, 4294967280  ;;  %s3836_s16 = sld [smem:[#allocation18_spill]]  ;;  %s3837_s20 = sld [smem:[#allocation16_spill]] }
0x1154   : > { %s3838_s15 = sld [smem:[#allocation19_spill]]  ;;  %s3839_s29 = smov %s3194_s30 }
0x1159   : > { %p27_p0 = scmp.ge.s32.totalorder %s3836_s16, 4   ;;  %s3840_s30 = smov %s3837_s20 }
0x115b   :  { %29 = sbr.rel (!%p27_p0) target bundleno = 10 (0xa), region = 128 }
0x1162   :  { %2284 = vsyncpa [#allocation3], 1 }
0x1163   :  { %2286 = vsyncpa [#allocation3 + $0x1], 1 }
0x1164   :  { %2287 = vsyncpa [#allocation6], 1 }
0x1165   :  { %2288 = vsyncpa [#allocation9], 1 }
0x1166   :  { %2289 = vsyncpa [#allocation4], 1 }
0x1167   :  { %2291 = vsyncpa [#allocation4 + $0x1], 1 }

</bundles_post_ra>
